<compile_context>
chip_gen: v5e
topology: v5e:2x2
jax: 0.10.0
libtpu: 0.0.40
codegen_flags: <defaults>
</compile_context>

<pallas_src>
import jax
import jax.numpy as jnp
from jax.experimental import pallas as pl
from jax.experimental.pallas import tpu as pltpu

HIDDEN1 = 512
HIDDEN2 = 128
HIDDEN3 = 32
OUTPUT_DIM = 2


def mlp_kernel(x_ref,            # (B, tk)      bf16   — K-chunk of the input
               w1_ref, b1_ref,   # (tk, H1) bf16 / (1, H1) f32
               w2_ref, b2_ref,   # (H1, H2) bf16 / (1, H2) f32
               w3_ref, b3_ref,   # (H2, H3) f32  / (1, H3) f32
               w4_ref, b4_ref,   # (H3, O)  f32  / (1, O)  f32
               o_ref,            # (B, O)   f32
               acc_ref):         # (B, H1)  f32 VMEM scratch (fc1 accumulator)
    k = pl.program_id(0)

    @pl.when(k == 0)
    def _():
        acc_ref[...] = jnp.zeros_like(acc_ref)

    # fc1 partial: bf16 x bf16 on the MXU, f32 accumulation.
    acc_ref[...] += jnp.dot(x_ref[...], w1_ref[...],
                            preferred_element_type=jnp.float32)

    @pl.when(k == pl.num_programs(0) - 1)
    def _():
        # fc1 epilogue + layers 2-4 (tiny: ~0.2 MFLOP total).
        h = jnp.maximum(acc_ref[...] + b1_ref[...], 0.0)            # relu(fc1)
        h = jnp.dot(h.astype(jnp.bfloat16), w2_ref[...],
                    preferred_element_type=jnp.float32) + b2_ref[...]
        h = jnp.maximum(h, 0.0)                                     # relu(fc2)
        h = jnp.dot(h, w3_ref[...],
                    preferred_element_type=jnp.float32) + b3_ref[...]
        h = jnp.maximum(h, 0.0)                                     # relu(fc3)
        out = jnp.dot(h, w4_ref[...],
                      preferred_element_type=jnp.float32) + b4_ref[...]
        o_ref[...] = out.astype(o_ref.dtype)


def dense_model_forward(x, params, *, tk=512):
    """x: (B, input_dim) f32. params: dict of (in,out) weights & (1,out) biases (f32)."""
    B, K = x.shape
    if K % tk != 0:
        tk = K  # fallback: no K-chunking if tk does not divide the input dim
    n_k = K // tk

    # bf16 only where the bytes matter (w1 dominates, w2 next); everything
    # small (w3, w4, biases) stays f32.
    x_bf = x.astype(jnp.bfloat16)
    w1 = params["w1"].astype(jnp.bfloat16)
    w2 = params["w2"].astype(jnp.bfloat16)
    w3, w4 = params["w3"], params["w4"]
    b1, b2, b3, b4 = params["b1"], params["b2"], params["b3"], params["b4"]

    def resident(a):
        # Same block every grid step -> fetched once, stays in VMEM.
        n = len(a.shape)
        return pl.BlockSpec(a.shape, lambda k, _n=n: (0,) * _n)

    return pl.pallas_call(
        mlp_kernel,
        out_shape=jax.ShapeDtypeStruct((B, OUTPUT_DIM), jnp.float32),
        grid=(n_k,),
        in_specs=[
            pl.BlockSpec((B, tk), lambda k: (0, k)),           # x, streamed over K
            pl.BlockSpec((tk, HIDDEN1), lambda k: (k, 0)),     # w1, streamed over K
            resident(b1),
            resident(w2), resident(b2),
            resident(w3), resident(b3),
            resident(w4), resident(b4),
        ],
        out_specs=pl.BlockSpec((B, OUTPUT_DIM), lambda k: (0, 0)),
        scratch_shapes=[pltpu.VMEM((B, HIDDEN1), jnp.float32)],
        compiler_params=pltpu.CompilerParams(
            dimension_semantics=("arbitrary",),   # K is a reduction axis
            vmem_limit_bytes=16 << 20,            # right-sized (safe on v7x's 64 MiB VMEM)
        ),
    )(x_bf, w1, b1, w2, b2, w3, b3, w4, b4)


def init_params(key, input_dim):
    """Deterministic init mimicking nn.Linear's U(-1/sqrt(fan_in), 1/sqrt(fan_in))."""
    dims = [(input_dim, HIDDEN1), (HIDDEN1, HIDDEN2),
            (HIDDEN2, HIDDEN3), (HIDDEN3, OUTPUT_DIM)]
    params = {}
    for i, (fan_in, fan_out) in enumerate(dims, start=1):
        key, kw, kb = jax.random.split(key, 3)
        bound = 1.0 / jnp.sqrt(fan_in)
        # stored as (in, out) = transpose of PyTorch's (out, in)
        params[f"w{i}"] = jax.random.uniform(kw, (fan_in, fan_out), jnp.float32, -bound, bound)
        params[f"b{i}"] = jax.random.uniform(kb, (1, fan_out), jnp.float32, -bound, bound)
    return params


def reference_forward(x, params):
    """Pure-JAX reference with the same bf16 casts as the kernel."""
    f32 = jnp.float32
    xb = x.astype(jnp.bfloat16).astype(f32)
    w1 = params["w1"].astype(jnp.bfloat16).astype(f32)
    w2 = params["w2"].astype(jnp.bfloat16).astype(f32)
    h = jnp.maximum(xb @ w1 + params["b1"], 0.0)
    h = jnp.maximum(h.astype(jnp.bfloat16).astype(f32) @ w2 + params["b2"], 0.0)
    h = jnp.maximum(h @ params["w3"] + params["b3"], 0.0)
    return h @ params["w4"] + params["b4"]


if __name__ == "__main__":
    QUEUE_SIZE = 512
    INPUT_DIM_PER_OBJ = 5
    INPUT_DIM = QUEUE_SIZE * INPUT_DIM_PER_OBJ  # 2560
    BATCH = 8

    key = jax.random.PRNGKey(0)
    key, kx = jax.random.split(key)
    x = jax.random.normal(kx, (BATCH, INPUT_DIM), jnp.float32)
    params = init_params(key, INPUT_DIM)

    out = dense_model_forward(x, params)
    out = jax.block_until_ready(out)

    ref = reference_forward(x, params)
    assert out.shape == (BATCH, OUTPUT_DIM)
    assert jnp.allclose(out, ref, atol=1e-2, rtol=1e-2), "mismatch vs pure-JAX reference"

    print("KERNEL_OK")
</pallas_src>

<mosaic_0001>
module attributes {stable_mosaic.version = 11 : i64} {
  func.func @mlp_kernel(%arg0: i32, %arg1: memref<8x512xbf16, #tpu.memory_space<vmem>>, %arg2: memref<512x512xbf16, #tpu.memory_space<vmem>>, %arg3: memref<1x512xf32, #tpu.memory_space<vmem>>, %arg4: memref<512x128xbf16, #tpu.memory_space<vmem>>, %arg5: memref<1x128xf32, #tpu.memory_space<vmem>>, %arg6: memref<128x32xf32, #tpu.memory_space<vmem>>, %arg7: memref<1x32xf32, #tpu.memory_space<vmem>>, %arg8: memref<32x2xf32, #tpu.memory_space<vmem>>, %arg9: memref<1x2xf32, #tpu.memory_space<vmem>>, %arg10: memref<8x2xf32, #tpu.memory_space<vmem>>, %arg11: memref<8x512xf32, #tpu.memory_space<vmem>>) attributes {dimension_semantics = [#tpu.dimension_semantics<arbitrary>], iteration_bounds = array<i64: 5>, scalar_prefetch = 0 : i64, scratch_operands = 1 : i64, tpu.core_type = #tpu.core_type<tc>, window_params = [{transform_indices = @transform_0, window_bounds = array<i64: 8, 512>}, {transform_indices = @transform_1, window_bounds = array<i64: 512, 512>}, {pipeline_mode = #tpu.pipeline_mode<synchronous>, transform_indices = @transform_2, window_bounds = array<i64: 1, 512>}, {pipeline_mode = #tpu.pipeline_mode<synchronous>, transform_indices = @transform_3, window_bounds = array<i64: 512, 128>}, {pipeline_mode = #tpu.pipeline_mode<synchronous>, transform_indices = @transform_4, window_bounds = array<i64: 1, 128>}, {pipeline_mode = #tpu.pipeline_mode<synchronous>, transform_indices = @transform_5, window_bounds = array<i64: 128, 32>}, {pipeline_mode = #tpu.pipeline_mode<synchronous>, transform_indices = @transform_6, window_bounds = array<i64: 1, 32>}, {pipeline_mode = #tpu.pipeline_mode<synchronous>, transform_indices = @transform_7, window_bounds = array<i64: 32, 2>}, {pipeline_mode = #tpu.pipeline_mode<synchronous>, transform_indices = @transform_8, window_bounds = array<i64: 1, 2>}, {pipeline_mode = #tpu.pipeline_mode<synchronous>, transform_indices = @transform_9, window_bounds = array<i64: 8, 2>}]} {
    %c0_i32 = arith.constant 0 : i32
    %0 = arith.cmpi eq, %arg0, %c0_i32 : i32
    %1 = arith.extui %0 : i1 to i32
    %c0_i32_0 = arith.constant 0 : i32
    %2 = arith.cmpi ne, %1, %c0_i32_0 : i32
    scf.if %2 {
      %cst_9 = arith.constant 0.000000e+00 : f32
      %12 = vector.broadcast %cst_9 : f32 to vector<8x512xf32>
      %c0_10 = arith.constant 0 : index
      %c0_11 = arith.constant 0 : index
      %13 = vector.load %arg11[%c0_10, %c0_11] : memref<8x512xf32, #tpu.memory_space<vmem>>, vector<8x512xf32>
      tpu.vector_store %arg11[%c0_10, %c0_11], %12 {strides = array<i32>} : memref<8x512xf32, #tpu.memory_space<vmem>>, vector<8x512xf32>,
    } else {
    }
    %c0 = arith.constant 0 : index
    %c0_1 = arith.constant 0 : index
    %3 = vector.load %arg11[%c0, %c0_1] : memref<8x512xf32, #tpu.memory_space<vmem>>, vector<8x512xf32>
    %c0_2 = arith.constant 0 : index
    %c0_3 = arith.constant 0 : index
    %4 = vector.load %arg1[%c0_2, %c0_3] : memref<8x512xbf16, #tpu.memory_space<vmem>>, vector<8x512xbf16>
    %c0_4 = arith.constant 0 : index
    %c0_5 = arith.constant 0 : index
    %5 = vector.load %arg2[%c0_4, %c0_5] : memref<512x512xbf16, #tpu.memory_space<vmem>>, vector<512x512xbf16>
    %cst = arith.constant dense<0.000000e+00> : vector<8x512xf32>
    %6 = tpu.matmul %4, %5, %cst {dimension_numbers = #tpu.dot_dimension_numbers<[1], [0], [0], [1], [0, 0, 1, 1], [], []>} : vector<8x512xbf16>, vector<512x512xbf16>, vector<8x512xf32> -> vector<8x512xf32>
    %7 = arith.addf %3, %6 : vector<8x512xf32>
    %c0_6 = arith.constant 0 : index
    %c0_7 = arith.constant 0 : index
    %8 = vector.load %arg11[%c0_6, %c0_7] : memref<8x512xf32, #tpu.memory_space<vmem>>, vector<8x512xf32>
    tpu.vector_store %arg11[%c0_6, %c0_7], %7 {strides = array<i32>} : memref<8x512xf32, #tpu.memory_space<vmem>>, vector<8x512xf32>,
    %c4_i32 = arith.constant 4 : i32
    %9 = arith.cmpi eq, %arg0, %c4_i32 : i32
    %10 = arith.extui %9 : i1 to i32
    %c0_i32_8 = arith.constant 0 : i32
    %11 = arith.cmpi ne, %10, %c0_i32_8 : i32
    scf.if %11 {
      %c0_9 = arith.constant 0 : index
      %c0_10 = arith.constant 0 : index
      %12 = vector.load %arg11[%c0_9, %c0_10] : memref<8x512xf32, #tpu.memory_space<vmem>>, vector<8x512xf32>
      %c0_11 = arith.constant 0 : index
      %c0_12 = arith.constant 0 : index
      %13 = vector.load %arg3[%c0_11, %c0_12] : memref<1x512xf32, #tpu.memory_space<vmem>>, vector<1x512xf32>
      %14 = vector.broadcast %13 : vector<1x512xf32> to vector<8x512xf32>
      %15 = arith.addf %12, %14 : vector<8x512xf32>
      %cst_13 = arith.constant 0.000000e+00 : f32
      %16 = vector.broadcast %cst_13 : f32 to vector<8x512xf32>
      %17 = arith.maximumf %15, %16 : vector<8x512xf32>
      %18 = arith.truncf %17 : vector<8x512xf32> to vector<8x512xbf16>
      %c0_14 = arith.constant 0 : index
      %c0_15 = arith.constant 0 : index
      %19 = vector.load %arg4[%c0_14, %c0_15] : memref<512x128xbf16, #tpu.memory_space<vmem>>, vector<512x128xbf16>
      %cst_16 = arith.constant dense<0.000000e+00> : vector<8x128xf32>
      %20 = tpu.matmul %18, %19, %cst_16 {dimension_numbers = #tpu.dot_dimension_numbers<[1], [0], [0], [1], [0, 0, 1, 1], [], []>} : vector<8x512xbf16>, vector<512x128xbf16>, vector<8x128xf32> -> vector<8x128xf32>
      %c0_17 = arith.constant 0 : index
      %c0_18 = arith.constant 0 : index
      %21 = vector.load %arg5[%c0_17, %c0_18] : memref<1x128xf32, #tpu.memory_space<vmem>>, vector<1x128xf32>
      %22 = vector.broadcast %21 : vector<1x128xf32> to vector<8x128xf32>
      %23 = arith.addf %20, %22 : vector<8x128xf32>
      %cst_19 = arith.constant 0.000000e+00 : f32
      %24 = vector.broadcast %cst_19 : f32 to vector<8x128xf32>
      %25 = arith.maximumf %23, %24 : vector<8x128xf32>
      %c0_20 = arith.constant 0 : index
      %c0_21 = arith.constant 0 : index
      %26 = vector.load %arg6[%c0_20, %c0_21] : memref<128x32xf32, #tpu.memory_space<vmem>>, vector<128x32xf32>
      %cst_22 = arith.constant dense<0.000000e+00> : vector<8x32xf32>
      %27 = tpu.matmul %25, %26, %cst_22 {dimension_numbers = #tpu.dot_dimension_numbers<[1], [0], [0], [1], [0, 0, 1, 1], [], []>} : vector<8x128xf32>, vector<128x32xf32>, vector<8x32xf32> -> vector<8x32xf32>
      %c0_23 = arith.constant 0 : index
      %c0_24 = arith.constant 0 : index
      %28 = vector.load %arg7[%c0_23, %c0_24] : memref<1x32xf32, #tpu.memory_space<vmem>>, vector<1x32xf32>
      %29 = vector.broadcast %28 : vector<1x32xf32> to vector<8x32xf32>
      %30 = arith.addf %27, %29 : vector<8x32xf32>
      %cst_25 = arith.constant 0.000000e+00 : f32
      %31 = vector.broadcast %cst_25 : f32 to vector<8x32xf32>
      %32 = arith.maximumf %30, %31 : vector<8x32xf32>
      %c0_26 = arith.constant 0 : index
      %c0_27 = arith.constant 0 : index
      %33 = vector.load %arg8[%c0_26, %c0_27] : memref<32x2xf32, #tpu.memory_space<vmem>>, vector<32x2xf32>
      %cst_28 = arith.constant dense<0.000000e+00> : vector<8x2xf32>
      %34 = tpu.matmul %32, %33, %cst_28 {dimension_numbers = #tpu.dot_dimension_numbers<[1], [0], [0], [1], [0, 0, 1, 1], [], []>} : vector<8x32xf32>, vector<32x2xf32>, vector<8x2xf32> -> vector<8x2xf32>
      %c0_29 = arith.constant 0 : index
      %c0_30 = arith.constant 0 : index
      %35 = vector.load %arg9[%c0_29, %c0_30] : memref<1x2xf32, #tpu.memory_space<vmem>>, vector<1x2xf32>
      %36 = vector.broadcast %35 : vector<1x2xf32> to vector<8x2xf32>
      %37 = arith.addf %34, %36 : vector<8x2xf32>
      %c0_31 = arith.constant 0 : index
      %c0_32 = arith.constant 0 : index
      %38 = vector.load %arg10[%c0_31, %c0_32] : memref<8x2xf32, #tpu.memory_space<vmem>>, vector<8x2xf32>
      tpu.vector_store %arg10[%c0_31, %c0_32], %37 {strides = array<i32>} : memref<8x2xf32, #tpu.memory_space<vmem>>, vector<8x2xf32>,
    } else {
    }
    return
  }
  func.func @transform_0(%arg0: i32) -> (i32, i32) {
    %c0_i32 = arith.constant 0 : i32
    %c0_i32_0 = arith.constant 0 : i32
    return %c0_i32, %arg0 : i32, i32
  }
  func.func @transform_1(%arg0: i32) -> (i32, i32) {
    %c0_i32 = arith.constant 0 : i32
    %c0_i32_0 = arith.constant 0 : i32
    return %arg0, %c0_i32 : i32, i32
  }
  func.func @transform_2(%arg0: i32) -> (i32, i32) {
    %c0_i32 = arith.constant 0 : i32
    %c0_i32_0 = arith.constant 0 : i32
    %c0_i32_1 = arith.constant 0 : i32
    return %c0_i32, %c0_i32_0 : i32, i32
  }
  func.func @transform_3(%arg0: i32) -> (i32, i32) {
    %c0_i32 = arith.constant 0 : i32
    %c0_i32_0 = arith.constant 0 : i32
    %c0_i32_1 = arith.constant 0 : i32
    return %c0_i32, %c0_i32_0 : i32, i32
  }
  func.func @transform_4(%arg0: i32) -> (i32, i32) {
    %c0_i32 = arith.constant 0 : i32
    %c0_i32_0 = arith.constant 0 : i32
    %c0_i32_1 = arith.constant 0 : i32
    return %c0_i32, %c0_i32_0 : i32, i32
  }
  func.func @transform_5(%arg0: i32) -> (i32, i32) {
    %c0_i32 = arith.constant 0 : i32
    %c0_i32_0 = arith.constant 0 : i32
    %c0_i32_1 = arith.constant 0 : i32
    return %c0_i32, %c0_i32_0 : i32, i32
  }
  func.func @transform_6(%arg0: i32) -> (i32, i32) {
    %c0_i32 = arith.constant 0 : i32
    %c0_i32_0 = arith.constant 0 : i32
    %c0_i32_1 = arith.constant 0 : i32
    return %c0_i32, %c0_i32_0 : i32, i32
  }
  func.func @transform_7(%arg0: i32) -> (i32, i32) {
    %c0_i32 = arith.constant 0 : i32
    %c0_i32_0 = arith.constant 0 : i32
    %c0_i32_1 = arith.constant 0 : i32
    return %c0_i32, %c0_i32_0 : i32, i32
  }
  func.func @transform_8(%arg0: i32) -> (i32, i32) {
    %c0_i32 = arith.constant 0 : i32
    %c0_i32_0 = arith.constant 0 : i32
    %c0_i32_1 = arith.constant 0 : i32
    return %c0_i32, %c0_i32_0 : i32, i32
  }
  func.func @transform_9(%arg0: i32) -> (i32, i32) {
    %c0_i32 = arith.constant 0 : i32
    %c0_i32_0 = arith.constant 0 : i32
    %c0_i32_1 = arith.constant 0 : i32
    return %c0_i32, %c0_i32_0 : i32, i32
  }
}

</mosaic_0001>

<bundles_post_ra>
// kernel: tpu_custom_call.1
= control target key start
LH: loop header
LB: loop body
LE: loop exit
PB: predicated region body
PF: predicated region fallthrough
CT: control target
= control target key end

     0   :  { %s3764_s0 = inlined_call_operand.hbm [shape: bf16[8,2560], index: 0, kind: input, shape index: {}]   ;;  %s3765_s1 = inlined_call_operand.hbm [shape: bf16[2560,512], index: 1, kind: input, shape index: {}]   ;;  %s3766_s2 = inlined_call_operand.hbm [shape: f32[1,512], index: 2, kind: input, shape index: {}]   ;;  %s3767_s3 = inlined_call_operand.hbm [shape: bf16[512,128], index: 3, kind: input, shape index: {}]   ;;  %s3768_s4 = inlined_call_operand.hbm [shape: f32[1,128], index: 4, kind: input, shape index: {}]   ;;  %s3769_s5 = inlined_call_operand.vmem [shape: f32[128,32], index: 5, kind: input, shape index: {}]   ;;  %s3770_s6 = inlined_call_operand.hbm [shape: f32[1,32], index: 6, kind: input, shape index: {}]   ;;  %s3771_s7 = inlined_call_operand.vmem [shape: f32[32,2], index: 7, kind: input, shape index: {}]   ;;  %s3772_s8 = inlined_call_operand.hbm [shape: f32[1,2], index: 8, kind: input, shape index: {}]   ;;  %s3773_s9 = inlined_call_operand.vmem [shape: f32[8,2], index: 9, kind: output, shape index: {}]  }
   0x1   :  { %3774 = sst [smem:[#allocation19_spill]] %s3766_s2 }
   0x2   :  { %3775 = sst [smem:[#allocation20_spill]] %s3767_s3 }
   0x3   :  { %3776 = sst [smem:[#allocation21_spill]] %s3768_s4 }
   0x4   :  { %3777 = sst [smem:[#allocation22_spill]] %s3770_s6 }
   0x5   :  { %3778 = sst [smem:[#allocation23_spill]] %s3772_s8 }
   0x6   :  { %14 = vsyncpa [#allocation4], 0 }
   0x7   :  { %16 = vsyncpa [#allocation4 + $0x1], 0 }
   0x8   :  { %17 = vsyncpa [#allocation6], 0 }
   0x9   :  { %19 = vsyncpa [#allocation6 + $0x1], 0 }
   0xa   :  { %20 = vsyncpa [#allocation9], 0 }
   0xb   :  { %21 = vsyncpa [#allocation12], 0  ;;  %s3252_s30 = smov 0   ;;  %s3254_s10 = smov 0  }
   0xc   :  { %s3256_s11 = smov 0   ;;  %s3258_s12 = smov 0  }
   0xd LB: > { %s3779_s2 = sld [smem:[#allocation19_spill]]  ;;  %s3276_s16 = sadd.s32 4294967295, %s3190_s12   ;;  %s3190_s12 = sphi %s3258_s12, %s3791_s12   ;;  %s3186_s11 = sphi %s3256_s11, %s3790_s11   ;;  %s3182_s10 = sphi %s3254_s10, %s3789_s10   ;;  %s3178_s30 = sphi %s3252_s30, %s3788_s30  }
   0xe   : > { %p1997_p0 = scmp.ge.s32.totalorder %s3190_s12, 1  ;;  %p48_p1 = scmp.eq.s32.totalorder %s3276_s16, 0 }
   0xf   : > { %p252_p2 = scmp.lt.s32.totalorder %s3190_s12, 6  ;;  %p1998_p3 = scmp.ne.s32.totalorder %s3276_s16, 0 }
  0x10   : > { %s3192_s18 = smov [#allocation7]   ;;  %s3781_s3 = sld [smem:[#allocation20_spill]] }
  0x11   : > { %p3282_p4 = pnand %p1997_p0, %p252_p2  ;;  %s266_s19 = sshll.u32 %s3192_s18, 4  ;;  %s267_s19 = int_to_ptr.vmem [resolvable:$true] %s266_s19 }
  0x12   : > { %s3193_s24 = smov [#allocation8]   ;;  %s3194_s26 = smov 64  }
  0x13   : > { %s264_s15 = sshll.u32 %s3779_s2, 4  ;;  %p2851_p5 = pneg %p3282_p4  ;;  %s265_s15 = int_to_ptr.hbm [resolvable:$true] %s264_s15 }
  0x14   : > { %s277_s25 = sshll.u32 %s3193_s24, 4  ;;  %s3195_s27 = smov 4   ;;  %s278_s25 = int_to_ptr.vmem [resolvable:$true] %s277_s25 }
  0x15   : > { %p3293_p6 = pnand %p2851_p5, %p48_p1  ;;  %s3783_s6 = sld [smem:[#allocation22_spill]] }
  0x16   : > { %s275_s22 = sshll.u32 %s3781_s3, 4  ;;  %s3196_s14 = smov [#allocation11]   ;;  %s276_s22 = int_to_ptr.hbm [resolvable:$true] %s275_s22 }
  0x17   : > { %2854 = dma.hbm_to_vmem [thread:$0]  (!%p3293_p6), %s265_s15, 64, %s267_s19, [#allocation6]  }
  0x18   : > { %2857 = dma.hbm_to_vmem [thread:$0]  (!%p3293_p6), %s276_s22, 4096, %s278_s25, [#allocation9], %s3194_s26, %s3194_s26, %s3195_s27  }
  0x19   : > { %s307_s18 = sshll.u32 %s3196_s14, 4  ;;  %s3784_s4 = sld [smem:[#allocation21_spill]]  ;;  %s308_s18 = int_to_ptr.vmem [resolvable:$true] %s307_s18 }
  0x1a   : > { %s3197_s19 = smov [#allocation10]   ;;  %s3785_s8 = sld [smem:[#allocation23_spill]] }
  0x1b   : > { %s305_s13 = sshll.u32 %s3783_s6, 4  ;;  %s292_s22 = sshll.u32 %s3197_s19, 4  ;;  %s306_s13 = int_to_ptr.hbm [resolvable:$true] %s305_s13  ;;  %s293_s22 = int_to_ptr.vmem [resolvable:$true] %s292_s22 }
  0x1c   : > { %2863 = dma.hbm_to_vmem [thread:$0]  (!%p3293_p6), %s306_s13, 16, %s308_s18, [#allocation12]  }
  0x1d   : > { %s3198_s27 = smov [#allocation13]   ;;  %s3317_s29 = sadd.s32 1, %s3190_s12  }
  0x1e   : > { %s322_s28 = sshll.u32 %s3198_s27, 4  ;;  %s31_s13 = ssub.s32 %s3190_s12, %s3317_s29  ;;  %s323_s28 = int_to_ptr.vmem [resolvable:$true] %s322_s28 }
  0x1f   : > { %s290_s15 = sshll.u32 %s3784_s4, 4  ;;  %s34_s14 = sadd.s32 1, %s3186_s11  ;;  %s291_s15 = int_to_ptr.hbm [resolvable:$true] %s290_s15 }
  0x20   : > { %s320_s26 = sshll.u32 %s3785_s8, 4  ;;  %p32_p7 = scmp.eq.s32.totalorder %s31_s13, 0  ;;  %s321_s26 = int_to_ptr.hbm [resolvable:$true] %s320_s26 }
  0x21   : > { %2860 = dma.hbm_to_vmem [thread:$0]  (!%p3293_p6), %s291_s15, 16, %s293_s22, [#allocation9]  }
  0x22   : > { %2866 = dma.hbm_to_vmem [thread:$0]  (!%p3293_p6), %s321_s26, 16, %s323_s28, [#allocation12]  }
  0x23   : > { %p41_p8 = scmp.ne.s32.totalorder %s3186_s11, %s3182_s10  ;;  %p42_p9 = scmp.eq.s32.totalorder %s3190_s12, 0 }
  0x24   : > { %p47_p10 = scmp.ne.s32.totalorder %s3182_s10, %s3178_s30  ;;  %p2879_p13 = scmp.lt.s32.totalorder %s3190_s12, 5 }
  0x25   : > { %s3328_s18 = scalar_select %p32_p7, %s3186_s11, %s34_s14  }
  0x26   : > { %p43_p11 = por %p42_p9, %p41_p8  ;;  %p3332_p12 = por %p48_p1, %p47_p10 }
  0x27   : > { %s333_s23 = sand.u32 1, %s3186_s11   ;;  %s2664_s15 = sshll.u32 %s3190_s12, 4 }
  0x28   : > { %s2004_s21 = sshll.u32 %s333_s23, 4  ;;  %s342_s24 = scalar_lea.hbm %s3764_s0, %s2664_s15 }
  0x29   : > { %s337_s25 = scalar_lea.vmem [#allocation3], %s2004_s21  ;;  %s344_s30 = sshll.u32 %s342_s24, 4  ;;  %s345_s30 = int_to_ptr.hbm [resolvable:$true] %s344_s30 }
  0x2a   : > { %s346_s26 = sshll.u32 %s337_s25, 4  ;;  %p3342_p0 = pnand %p2879_p13, %p43_p11  ;;  %s347_s26 = int_to_ptr.vmem [resolvable:$true] %s346_s26 }
  0x2b   : > { %s2007_s28 = sshll.u32 %s333_s23, 10  ;;  %s353_s13 = sand.u32 1, %s3190_s12  }
  0x2c   : > { %s334_s14 = scalar_lea.sflag [#allocation4], %s333_s23  ;;  %s3080_s2 = sshra.s32 %s345_s30, 4  ;;  %s3081_s2 = int_to_ptr.hbm [resolvable:$true] %s3080_s2 }
  0x2d   : > { %s3082_s3 = scalar_lea.hbm %s3081_s2, 16  ;;  %p3084_p5 = pneg %p3342_p0 }
  0x2e   : > { %p3083_p2 = scmp.ne.s32.totalorder %s3081_s2, %s3082_s3  ;;  %s3087_s19 = scalar_lea.hbm %s3764_s0, 80 }
  0x2f   : > { %p3088_p8 = scmp.lt.s32.totalorder %s3081_s2, %s3764_s0  ;;  %p3089_p9 = scmp.lt.s32.totalorder %s3087_s19, %s3082_s3 }
  0x30   : > { %p3085_p6 = pnand %p3084_p5, %p3083_p2 }
  0x31   : > { %p3090_p10 = por %p3089_p9, %p3088_p8 }
  0x32   : > { %p3086_p7 = pneg %p3085_p6 }
  0x34   : > { %p3091_p11 = pnand %p3090_p10, %p3086_p7 }
  0x36   : > { %3094 = shalt.err (!%p3091_p11)
}
  0x37   : > { %2870 = dma.hbm_to_vmem [thread:$0]  (!%p3342_p0), %s345_s30, 256, %s347_s26, %s334_s14  }
  0x38   : > { %s357_s23 = scalar_lea.vmem [#allocation5], %s2007_s28  ;;  %s2666_s4 = sshll.u32 %s3190_s12, 10 }
  0x39   : > { %s366_s25 = sshll.u32 %s357_s23, 4  ;;  %s363_s15 = scalar_lea.hbm %s3765_s1, %s2666_s4  ;;  %s367_s25 = int_to_ptr.vmem [resolvable:$true] %s366_s25 }
  0x3a   : > { %s364_s8 = sshll.u32 %s363_s15, 4  ;;  %s354_s2 = scalar_lea.sflag [#allocation6], %s353_s13  ;;  %s365_s8 = int_to_ptr.hbm [resolvable:$true] %s364_s8 }
  0x3b   : > { %s3110_s3 = sshra.s32 %s365_s8, 4  ;;  %s3117_s28 = scalar_lea.hbm %s3765_s1, 5120  ;;  %s3111_s3 = int_to_ptr.hbm [resolvable:$true] %s3110_s3 }
  0x3c   : > { %s3112_s19 = scalar_lea.hbm %s3111_s3, 1024  ;;  %p3118_p7 = scmp.lt.s32.totalorder %s3111_s3, %s3765_s1 }
  0x3d   : > { %p3113_p13 = scmp.ne.s32.totalorder %s3111_s3, %s3112_s19  ;;  %p3119_p8 = scmp.lt.s32.totalorder %s3117_s28, %s3112_s19 }
  0x3f   : > { %p3115_p2 = pnand %p3113_p13, %p3084_p5  ;;  %p3120_p9 = por %p3119_p8, %p3118_p7 }
  0x41   : > { %p3116_p6 = pneg %p3115_p2 }
  0x43   : > { %p3121_p10 = pnand %p3120_p9, %p3116_p6 }
  0x45   : > { %3124 = shalt.err (!%p3121_p10)
}
  0x46   : > { %s3199_s4 = smov 256   ;;  %s3200_s6 = smov 16  }
  0x47   : > { %2873 = dma.hbm_to_vmem [thread:$0]  (!%p3342_p0), %s365_s8, 16384, %s367_s25, %s354_s2, %s3199_s4, %s3199_s4, %s3200_s6  }
  0x48   : > { %378 = sbr.rel (%p3282_p4) target bundleno = 801 (0x321), region = 56  ;;  %s380_s13 = sand.u32 (!%p3282_p4), 1, %s3182_s10  }
  0x49   : > { %s2012_s22 = sshll.u32 (!%p3282_p4), %s380_s13, 4  ;;  %s381_s24 = scalar_lea.sflag (!%p3282_p4), [#allocation4], %s380_s13 }
  0x4a   : > { %s3378_s23 = scalar_lea.vmem (!%p3282_p4), [#allocation3], %s2012_s22 }
  0x4d   : > { %3157 = dma.done.wait (%p3332_p12), %s381_s24, 256  }
  0x4e   : > { %3159 = vsyncadd (%p3332_p12), %s381_s24, 4294967040  ;;  %s390_s21 = sand.u32 1, %s3276_s16   ;;  %s2013_s27 = sshll.u32 %s380_s13, 10 }
  0x4f   : > { %s391_s8 = scalar_lea.sflag [#allocation6], %s390_s21  ;;  %s3385_s25 = scalar_lea.vmem [#allocation5], %s2013_s27 }
  0x50   : > { %3161 = dma.done.wait (%p3332_p12), %s391_s8, 16384  }
  0x51   : > { %3163 = vsyncadd (%p3332_p12), %s391_s8, 4294950912 }
  0x52   : > { %3165 = dma.done.wait (%p48_p1), [#allocation6], 64  }
  0x53   : > { %3167 = vsyncadd (%p48_p1), [#allocation6], 4294967232 }
  0x54   : > { %3169 = dma.done.wait (%p48_p1), [#allocation9], 4112  }
  0x55   : > { %3171 = vsyncadd (%p48_p1), [#allocation9], 4294963184 }
  0x56   : > { %3173 = dma.done.wait (%p48_p1), [#allocation12], 32  }
  0x57   : > { %3175 = vsyncadd (%p48_p1), [#allocation12], 4294967264  ;;  %460 = sbr.rel (%p1998_p3) target bundleno = 97 (0x61), region = 88 }
  0x5c   : > { %v3201_v0 = vmov 0.0  }
  0x5d   : > { %461 = vst [vmem:[#allocation2 + $0x10] sm:$0xff] %v3201_v0 }
  0x5e   : > { %462 = vst [vmem:[#allocation2] sm:$0xff] %v3201_v0 }
  0x5f   : > { %463 = vst [vmem:[#allocation2 + $0x18] sm:$0xff] %v3201_v0 }
  0x60   : > { %464 = vst [vmem:[#allocation2 + $0x8] sm:$0xff] %v3201_v0 }
  0x61 PF: > { %v2134_v1 = vld [vmem:[%s3385_s25 + $0xe0] sm:$0xf]  ;;  %v2697_v2 = vld [vmem:[%s3385_s25 + $0xec] sm:$0xf0]  ;;  %p2532_p1 = scmp.ne.s32.totalorder %s3276_s16, 4 }
  0x62   : > { %v2262_v3 = vld [vmem:[%s3385_s25 + $0x1e0] sm:$0xf]  ;;  %v2135_v4 = vor.u32 %v2697_v2, %v2134_v1  ;;  %v2729_v5 = vld [vmem:[%s3385_s25 + $0x1ec] sm:$0xf0] }
  0x63   : > { %v2390_v6 = vld [vmem:[%s3385_s25 + $0x2e0] sm:$0xf]  ;;  %v2761_v7 = vld [vmem:[%s3385_s25 + $0x2ec] sm:$0xf0]  ;;  %v2263_v8 = vor.u32 %v2729_v5, %v2262_v3 }
  0x64   : > { %v2391_v9 = vor.u32 %v2761_v7, %v2390_v6  ;;  %v2518_v10 = vld [vmem:[%s3385_s25 + $0x3e0] sm:$0xf]  ;;  %v2793_v11 = vld [vmem:[%s3385_s25 + $0x3ec] sm:$0xf0]  ;;  %1253 = vmatpush.bf16.msra.mxu0 %v2135_v4 }
  0x65   : > { %v2118_v12 = vld [vmem:[%s3385_s25 + $0xc0] sm:$0xf]  ;;  %v2519_v13 = vor.u32 %v2793_v11, %v2518_v10  ;;  %v2693_v14 = vld [vmem:[%s3385_s25 + $0xcc] sm:$0xf0]  ;;  %1266 = vmatpush.bf16.msra.mxu1 %v2263_v8 }
  0x66   : > { %v2246_v15 = vld [vmem:[%s3385_s25 + $0x1c0] sm:$0xf]  ;;  %v2725_v16 = vld [vmem:[%s3385_s25 + $0x1cc] sm:$0xf0]  ;;  %1279 = vmatpush.bf16.msra.mxu2 %v2391_v9  ;;  %v2119_v17 = vor.u32 %v2693_v14, %v2118_v12 }
  0x67   : > { %v2247_v18 = vor.u32 %v2725_v16, %v2246_v15  ;;  %v2374_v19 = vld [vmem:[%s3385_s25 + $0x2c0] sm:$0xf]  ;;  %v2757_v20 = vld [vmem:[%s3385_s25 + $0x2cc] sm:$0xf0]  ;;  %1292 = vmatpush.bf16.msra.mxu3 %v2519_v13 }
  0x68   : > { %v2502_v21 = vld [vmem:[%s3385_s25 + $0x3c0] sm:$0xf]  ;;  %v2375_v22 = vor.u32 %v2757_v20, %v2374_v19  ;;  %v2789_v23 = vld [vmem:[%s3385_s25 + $0x3cc] sm:$0xf0]  ;;  %1254 = vmatpush.bf16.msra.mxu0 %v2119_v17 }
  0x69   : > { %v2102_v24 = vld [vmem:[%s3385_s25 + $0xa0] sm:$0xf]  ;;  %v2689_v25 = vld [vmem:[%s3385_s25 + $0xac] sm:$0xf0]  ;;  %v2503_v26 = vor.u32 %v2789_v23, %v2502_v21  ;;  %1267 = vmatpush.bf16.msra.mxu1 %v2247_v18 }
  0x6a   : > { %v2230_v27 = vld [vmem:[%s3385_s25 + $0x1a0] sm:$0xf]  ;;  %v2721_v28 = vld [vmem:[%s3385_s25 + $0x1ac] sm:$0xf0]  ;;  %v2103_v30 = vor.u32 %v2689_v25, %v2102_v24  ;;  %1280 = vmatpush.bf16.msra.mxu2 %v2375_v22 }
  0x6b   : > { %v2358_v29 = vld [vmem:[%s3385_s25 + $0x2a0] sm:$0xf]  ;;  %v2753_v31 = vld [vmem:[%s3385_s25 + $0x2ac] sm:$0xf0]  ;;  %v2231_v34 = vor.u32 %v2721_v28, %v2230_v27  ;;  %1293 = vmatpush.bf16.msra.mxu3 %v2503_v26 }
  0x6c   : > { %v2486_v32 = vld [vmem:[%s3385_s25 + $0x3a0] sm:$0xf]  ;;  %v2785_v33 = vld [vmem:[%s3385_s25 + $0x3ac] sm:$0xf0]  ;;  %v2359_v35 = vor.u32 %v2753_v31, %v2358_v29  ;;  %1255 = vmatpush.bf16.msra.mxu0 %v2103_v30  ;;  %v2695_v29 = vld [vmem:[%s3385_s25 + $0xe4] sm:$0xf] }
  0x6d   : > { %v2086_v36 = vld [vmem:[%s3385_s25 + $0x80] sm:$0xf]  ;;  %v2685_v37 = vld [vmem:[%s3385_s25 + $0x8c] sm:$0xf0]  ;;  %v2487_v39 = vor.u32 %v2785_v33, %v2486_v32  ;;  %1268 = vmatpush.bf16.msra.mxu1 %v2231_v34  ;;  %v2136_v30 = vld [vmem:[%s3385_s25 + $0xf0] sm:$0xf0] }
  0x6e   : > { %v2214_v38 = vld [vmem:[%s3385_s25 + $0x180] sm:$0xf]  ;;  %v2717_v40 = vld [vmem:[%s3385_s25 + $0x18c] sm:$0xf0]  ;;  %v2087_v45 = vor.u32 %v2685_v37, %v2086_v36  ;;  %1281 = vmatpush.bf16.msra.mxu2 %v2359_v35  ;;  %v2727_v31 = vld [vmem:[%s3385_s25 + $0x1e4] sm:$0xf] }
  0x6f   : > { %v2342_v41 = vld [vmem:[%s3385_s25 + $0x280] sm:$0xf]  ;;  %v2749_v42 = vld [vmem:[%s3385_s25 + $0x28c] sm:$0xf0]  ;;  %v2215_v46 = vor.u32 %v2717_v40, %v2214_v38  ;;  %1294 = vmatpush.bf16.msra.mxu3 %v2487_v39  ;;  %v2264_v33 = vld [vmem:[%s3385_s25 + $0x1f0] sm:$0xf0] }
  0x70   : > { %v2470_v43 = vld [vmem:[%s3385_s25 + $0x380] sm:$0xf]  ;;  %v2781_v44 = vld [vmem:[%s3385_s25 + $0x38c] sm:$0xf0]  ;;  %v2343_v47 = vor.u32 %v2749_v42, %v2342_v41  ;;  %1256 = vmatpush.bf16.msra.mxu0 %v2087_v45  ;;  %v2759_v34 = vld [vmem:[%s3385_s25 + $0x2e4] sm:$0xf]  ;;  %v2139_v41 = vor.u32 %v2695_v29, %v2136_v30  ;;  %v2267_v42 = vor.u32 %v2727_v31, %v2264_v33 }
  0x71   : > { %v2070_v48 = vld [vmem:[%s3385_s25 + $0x60] sm:$0xf]  ;;  %v2681_v49 = vld [vmem:[%s3385_s25 + $0x6c] sm:$0xf0]  ;;  %v2471_v51 = vor.u32 %v2781_v44, %v2470_v43  ;;  %1269 = vmatpush.bf16.msra.mxu1 %v2215_v46  ;;  %v2392_v35 = vld [vmem:[%s3385_s25 + $0x2f0] sm:$0xf0] }
  0x72   : > { %v2198_v50 = vld [vmem:[%s3385_s25 + $0x160] sm:$0xf]  ;;  %v2713_v52 = vld [vmem:[%s3385_s25 + $0x16c] sm:$0xf0]  ;;  %v2071_v57 = vor.u32 %v2681_v49, %v2070_v48  ;;  %1282 = vmatpush.bf16.msra.mxu2 %v2343_v47  ;;  %v2791_v38 = vld [vmem:[%s3385_s25 + $0x3e4] sm:$0xf]  ;;  %v2395_v43 = vor.u32 %v2759_v34, %v2392_v35 }
  0x73   : > { %v2326_v53 = vld [vmem:[%s3385_s25 + $0x260] sm:$0xf]  ;;  %v2745_v54 = vld [vmem:[%s3385_s25 + $0x26c] sm:$0xf0]  ;;  %v2199_v58 = vor.u32 %v2713_v52, %v2198_v50  ;;  %1295 = vmatpush.bf16.msra.mxu3 %v2471_v51  ;;  %v2520_v39 = vld [vmem:[%s3385_s25 + $0x3f0] sm:$0xf0] }
  0x74   : > { %v2454_v55 = vld [vmem:[%s3385_s25 + $0x360] sm:$0xf]  ;;  %v2777_v56 = vld [vmem:[%s3385_s25 + $0x36c] sm:$0xf0]  ;;  %v2327_v59 = vor.u32 %v2745_v54, %v2326_v53  ;;  %1257 = vmatpush.bf16.msra.mxu0 %v2071_v57  ;;  %v2691_v44 = vld [vmem:[%s3385_s25 + $0xc4] sm:$0xf]  ;;  %v2523_v47 = vor.u32 %v2791_v38, %v2520_v39 }
  0x75   : > { %v2054_v60 = vld [vmem:[%s3385_s25 + $0x40] sm:$0xf]  ;;  %v2677_v61 = vld [vmem:[%s3385_s25 + $0x4c] sm:$0xf0]  ;;  %v2455_v63 = vor.u32 %v2777_v56, %v2454_v55  ;;  %1270 = vmatpush.bf16.msra.mxu1 %v2199_v58  ;;  %v2120_v45 = vld [vmem:[%s3385_s25 + $0xd0] sm:$0xf0] }
  0x76   : > { %v2182_v62 = vld [vmem:[%s3385_s25 + $0x140] sm:$0xf]  ;;  %v2709_v0 = vld [vmem:[%s3385_s25 + $0x14c] sm:$0xf0]  ;;  %v2055_v5 = vor.u32 %v2677_v61, %v2054_v60  ;;  %1283 = vmatpush.bf16.msra.mxu2 %v2327_v59  ;;  %v2723_v46 = vld [vmem:[%s3385_s25 + $0x1c4] sm:$0xf]  ;;  %v2123_v53 = vor.u32 %v2691_v44, %v2120_v45 }
  0x77   : > { %v2310_v1 = vld [vmem:[%s3385_s25 + $0x240] sm:$0xf]  ;;  %v2741_v2 = vld [vmem:[%s3385_s25 + $0x24c] sm:$0xf0]  ;;  %v2183_v6 = vor.u32 %v2709_v0, %v2182_v62  ;;  %1296 = vmatpush.bf16.msra.mxu3 %v2455_v63  ;;  %v2248_v48 = vld [vmem:[%s3385_s25 + $0x1d0] sm:$0xf0] }
  0x78   : > { %v2438_v3 = vld [vmem:[%s3385_s25 + $0x340] sm:$0xf]  ;;  %v2773_v4 = vld [vmem:[%s3385_s25 + $0x34c] sm:$0xf0]  ;;  %v2311_v7 = vor.u32 %v2741_v2, %v2310_v1  ;;  %1258 = vmatpush.bf16.msra.mxu0 %v2055_v5  ;;  %v2755_v49 = vld [vmem:[%s3385_s25 + $0x2c4] sm:$0xf]  ;;  %v2251_v54 = vor.u32 %v2723_v46, %v2248_v48 }
  0x79   : > { %v2038_v8 = vld [vmem:[%s3385_s25 + $0x20] sm:$0xf]  ;;  %v2673_v9 = vld [vmem:[%s3385_s25 + $0x2c] sm:$0xf0]  ;;  %v2439_v11 = vor.u32 %v2773_v4, %v2438_v3  ;;  %1271 = vmatpush.bf16.msra.mxu1 %v2183_v6  ;;  %v2376_v50 = vld [vmem:[%s3385_s25 + $0x2d0] sm:$0xf0] }
  0x7a   : > { %v2166_v10 = vld [vmem:[%s3385_s25 + $0x120] sm:$0xf]  ;;  %v2705_v12 = vld [vmem:[%s3385_s25 + $0x12c] sm:$0xf0]  ;;  %v2039_v17 = vor.u32 %v2673_v9, %v2038_v8  ;;  %1284 = vmatpush.bf16.msra.mxu2 %v2311_v7  ;;  %v2787_v51 = vld [vmem:[%s3385_s25 + $0x3c4] sm:$0xf]  ;;  %v2379_v55 = vor.u32 %v2755_v49, %v2376_v50 }
  0x7b   : > { %v2294_v13 = vld [vmem:[%s3385_s25 + $0x220] sm:$0xf]  ;;  %v2737_v14 = vld [vmem:[%s3385_s25 + $0x22c] sm:$0xf0]  ;;  %v2167_v20 = vor.u32 %v2705_v12, %v2166_v10  ;;  %1297 = vmatpush.bf16.msra.mxu3 %v2439_v11  ;;  %v2504_v52 = vld [vmem:[%s3385_s25 + $0x3d0] sm:$0xf0] }
  0x7c   : > { %v2422_v15 = vld [vmem:[%s3385_s25 + $0x320] sm:$0xf]  ;;  %v2769_v16 = vld [vmem:[%s3385_s25 + $0x32c] sm:$0xf0]  ;;  %v2295_v21 = vor.u32 %v2737_v14, %v2294_v13  ;;  %1259 = vmatpush.bf16.msra.mxu0 %v2039_v17  ;;  %v2687_v56 = vld [vmem:[%s3385_s25 + $0xa4] sm:$0xf]  ;;  %v2507_v59 = vor.u32 %v2787_v51, %v2504_v52 }
  0x7d   : > { %v2022_v18 = vld [vmem:[%s3385_s25] sm:$0xf]  ;;  %v2669_v19 = vld [vmem:[%s3385_s25 + $0xc] sm:$0xf0]  ;;  %v2423_v25 = vor.u32 %v2769_v16, %v2422_v15  ;;  %1272 = vmatpush.bf16.msra.mxu1 %v2167_v20  ;;  %v2104_v57 = vld [vmem:[%s3385_s25 + $0xb0] sm:$0xf0] }
  0x7e   : > { %v2150_v22 = vld [vmem:[%s3385_s25 + $0x100] sm:$0xf]  ;;  %v2701_v23 = vld [vmem:[%s3385_s25 + $0x10c] sm:$0xf0]  ;;  %v2023_v32 = vor.u32 %v2669_v19, %v2022_v18  ;;  %1285 = vmatpush.bf16.msra.mxu2 %v2295_v21  ;;  %v2719_v58 = vld [vmem:[%s3385_s25 + $0x1a4] sm:$0xf]  ;;  %v2107_v1 = vor.u32 %v2687_v56, %v2104_v57 }
  0x7f   : > { %v2278_v24 = vld [vmem:[%s3385_s25 + $0x200] sm:$0xf]  ;;  %v2733_v26 = vld [vmem:[%s3385_s25 + $0x20c] sm:$0xf0]  ;;  %v2151_v36 = vor.u32 %v2701_v23, %v2150_v22  ;;  %1298 = vmatpush.bf16.msra.mxu3 %v2423_v25  ;;  %v2232_v60 = vld [vmem:[%s3385_s25 + $0x1b0] sm:$0xf0] }
  0x80   : > { %v2406_v27 = vld [vmem:[%s3385_s25 + $0x300] sm:$0xf]  ;;  %v2765_v28 = vld [vmem:[%s3385_s25 + $0x30c] sm:$0xf0]  ;;  %v2279_v37 = vor.u32 %v2733_v26, %v2278_v24  ;;  %1260 = vmatpush.bf16.msra.mxu0 %v2023_v32  ;;  %v2751_v61 = vld [vmem:[%s3385_s25 + $0x2a4] sm:$0xf]  ;;  %v2235_v3 = vor.u32 %v2719_v58, %v2232_v60 }
  0x81   : > { %v2407_v40 = vor.u32 %v2765_v28, %v2406_v27  ;;  %1273 = vmatpush.bf16.msra.mxu1 %v2151_v36  ;;  %v2360_v62 = vld [vmem:[%s3385_s25 + $0x2b0] sm:$0xf0]  ;;  %v2783_v63 = vld [vmem:[%s3385_s25 + $0x3a4] sm:$0xf]  ;;  %v470_v2 = vld [vmem:[%s3378_s23 + $0x8] sm:$0xff] }
  0x82   : > { %1286 = vmatpush.bf16.msra.mxu2 %v2279_v37  ;;  %v2488_v0 = vld [vmem:[%s3385_s25 + $0x3b0] sm:$0xf0]  ;;  %v2363_v4 = vor.u32 %v2751_v61, %v2360_v62  ;;  %v2683_v5 = vld [vmem:[%s3385_s25 + $0x84] sm:$0xf]  ;;  %v603_v8 = vunpack.c.l.b16 %v470_v2  ;;  %v604_v9 = vunpack.c.h.b16 %v470_v2 }
  0x83   : > { %1299 = vmatpush.bf16.msra.mxu3 %v2407_v40  ;;  %v2088_v6 = vld [vmem:[%s3385_s25 + $0x90] sm:$0xf0]  ;;  %v2715_v7 = vld [vmem:[%s3385_s25 + $0x184] sm:$0xf]  ;;  %v2491_v10 = vor.u32 %v2783_v63, %v2488_v0 }
  0x84   : > { %1305 = vmatpush.bf16.msrb.mxu0 %v2139_v41  ;;  %v2216_v11 = vld [vmem:[%s3385_s25 + $0x190] sm:$0xf0]  ;;  %v2747_v12 = vld [vmem:[%s3385_s25 + $0x284] sm:$0xf]  ;;  %v3502_v16 = vpack.c.b16 %v603_v8, %v603_v8  ;;  %v3504_v17 = vpack.c.b16 %v604_v9, %v604_v9  ;;  %v2091_v19 = vor.u32 %v2683_v5, %v2088_v6  ;;  %v2698_v8 = vld [vmem:[%s3385_s25 + $0xf4] sm:$0xf0] }
  0x85   : > { %1318 = vmatpush.bf16.msrb.mxu1 %v2267_v42  ;;  %v2344_v13 = vld [vmem:[%s3385_s25 + $0x290] sm:$0xf0]  ;;  %v2779_v14 = vld [vmem:[%s3385_s25 + $0x384] sm:$0xf]  ;;  %v2219_v22 = vor.u32 %v2715_v7, %v2216_v11  ;;  %v2142_v7 = vld [vmem:[%s3385_s25 + $0xe8] sm:$0xf] }
  0x86   : > { %1331 = vmatpush.bf16.msrb.mxu2 %v2395_v43  ;;  %v2472_v15 = vld [vmem:[%s3385_s25 + $0x390] sm:$0xf0]  ;;  %v2347_v23 = vor.u32 %v2747_v12, %v2344_v13  ;;  %v2679_v24 = vld [vmem:[%s3385_s25 + $0x64] sm:$0xf]  ;;  %1300 = vmatmul.bf16.vlgmr.msra.gmra.mxu3 %v3504_v17  ;;  %v2270_v9 = vld [vmem:[%s3385_s25 + $0x1e8] sm:$0xf] }
  0x87   : > { %1344 = vmatpush.bf16.msrb.mxu3 %v2523_v47  ;;  %v469_v18 = vld [vmem:[%s3378_s23] sm:$0xff]  ;;  %v2475_v27 = vor.u32 %v2779_v14, %v2472_v15  ;;  %1287 = vmatmul.bf16.vlgmr.msra.gmra.mxu2 %v3502_v16  ;;  %v2730_v11 = vld [vmem:[%s3385_s25 + $0x1f4] sm:$0xf0]  ;;  %v2398_v12 = vld [vmem:[%s3385_s25 + $0x2e8] sm:$0xf] }
  0x88   : > { %1306 = vmatpush.bf16.msrb.mxu0 %v2123_v53  ;;  %v601_v20 = vunpack.c.l.b16 %v469_v18  ;;  %v602_v21 = vunpack.c.h.b16 %v469_v18  ;;  %v2072_v25 = vld [vmem:[%s3385_s25 + $0x70] sm:$0xf0]  ;;  %v2711_v26 = vld [vmem:[%s3385_s25 + $0x164] sm:$0xf]  ;;  %v2762_v13 = vld [vmem:[%s3385_s25 + $0x2f4] sm:$0xf0] }
  0x89   : > { %1319 = vmatpush.bf16.msrb.mxu1 %v2251_v54  ;;  %v2200_v28 = vld [vmem:[%s3385_s25 + $0x170] sm:$0xf0]  ;;  %v2743_v29 = vld [vmem:[%s3385_s25 + $0x264] sm:$0xf]  ;;  %v2075_v35 = vor.u32 %v2679_v24, %v2072_v25  ;;  %v2526_v18 = vld [vmem:[%s3385_s25 + $0x3e8] sm:$0xf] }
  0x8a   : > { %1332 = vmatpush.bf16.msrb.mxu2 %v2379_v55  ;;  %v2328_v30 = vld [vmem:[%s3385_s25 + $0x270] sm:$0xf0]  ;;  %v3514_v31 = vpack.c.b16 %v601_v20, %v601_v20  ;;  %v3516_v32 = vpack.c.b16 %v602_v21, %v602_v21  ;;  %v2775_v33 = vld [vmem:[%s3385_s25 + $0x364] sm:$0xf]  ;;  %v2203_v36 = vor.u32 %v2711_v26, %v2200_v28  ;;  %v2143_v21 = vor.u32 %v2698_v8, %v2142_v7  ;;  %v2126_v24 = vld [vmem:[%s3385_s25 + $0xc8] sm:$0xf] }
  0x8b   : > { %1345 = vmatpush.bf16.msrb.mxu3 %v2507_v59  ;;  %v2456_v34 = vld [vmem:[%s3385_s25 + $0x370] sm:$0xf0]  ;;  %v2331_v37 = vor.u32 %v2743_v29, %v2328_v30  ;;  %v2675_v38 = vld [vmem:[%s3385_s25 + $0x44] sm:$0xf]  ;;  %v2694_v25 = vld [vmem:[%s3385_s25 + $0xd4] sm:$0xf0] }
  0x8c   : > { %1307 = vmatpush.bf16.msrb.mxu0 %v2107_v1  ;;  %1274 = vmatmul.bf16.vlgmr.msra.gmra.mxu1 %v3516_v32  ;;  %v2056_v39 = vld [vmem:[%s3385_s25 + $0x50] sm:$0xf0]  ;;  %v2707_v40 = vld [vmem:[%s3385_s25 + $0x144] sm:$0xf]  ;;  %v2459_v41 = vor.u32 %v2775_v33, %v2456_v34  ;;  %v2254_v26 = vld [vmem:[%s3385_s25 + $0x1c8] sm:$0xf] }
  0x8d   : > { %1320 = vmatpush.bf16.msrb.mxu1 %v2235_v3  ;;  %v2184_v42 = vld [vmem:[%s3385_s25 + $0x150] sm:$0xf0]  ;;  %v2739_v43 = vld [vmem:[%s3385_s25 + $0x244] sm:$0xf]  ;;  %1261 = vmatmul.bf16.vlgmr.msra.gmra.mxu0 %v3514_v31  ;;  %v2059_v47 = vor.u32 %v2675_v38, %v2056_v39  ;;  %v2726_v28 = vld [vmem:[%s3385_s25 + $0x1d4] sm:$0xf0] }
  0x8e   : > { %1333 = vmatpush.bf16.msrb.mxu2 %v2363_v4  ;;  %v2312_v44 = vld [vmem:[%s3385_s25 + $0x250] sm:$0xf0]  ;;  %v2771_v45 = vld [vmem:[%s3385_s25 + $0x344] sm:$0xf]  ;;  %v2187_v48 = vor.u32 %v2707_v40, %v2184_v42  ;;  %v2382_v29 = vld [vmem:[%s3385_s25 + $0x2c8] sm:$0xf] }
  0x8f   : > { %1346 = vmatpush.bf16.msrb.mxu3 %v2491_v10  ;;  %v2440_v46 = vld [vmem:[%s3385_s25 + $0x350] sm:$0xf0]  ;;  %v2315_v49 = vor.u32 %v2739_v43, %v2312_v44  ;;  %v2671_v50 = vld [vmem:[%s3385_s25 + $0x24] sm:$0xf]  ;;  %v2758_v30 = vld [vmem:[%s3385_s25 + $0x2d4] sm:$0xf0] }
  0x90   : > { %1308 = vmatpush.bf16.msrb.mxu0 %v2091_v19  ;;  %v2040_v51 = vld [vmem:[%s3385_s25 + $0x30] sm:$0xf0]  ;;  %v2703_v52 = vld [vmem:[%s3385_s25 + $0x124] sm:$0xf]  ;;  %v2443_v53 = vor.u32 %v2771_v45, %v2440_v46  ;;  %v2794_v19 = vld [vmem:[%s3385_s25 + $0x3f4] sm:$0xf0] }
  0x91   : > { %1321 = vmatpush.bf16.msrb.mxu1 %v2219_v22  ;;  %v2168_v54 = vld [vmem:[%s3385_s25 + $0x130] sm:$0xf0]  ;;  %v2735_v55 = vld [vmem:[%s3385_s25 + $0x224] sm:$0xf]  ;;  %v2043_v59 = vor.u32 %v2671_v50, %v2040_v51  ;;  %v2271_v22 = vor.u32 %v2730_v11, %v2270_v9  ;;  %v2510_v33 = vld [vmem:[%s3385_s25 + $0x3c8] sm:$0xf] }
  0x92   : > { %1334 = vmatpush.bf16.msrb.mxu2 %v2347_v23  ;;  %v2296_v56 = vld [vmem:[%s3385_s25 + $0x230] sm:$0xf0]  ;;  %v2767_v57 = vld [vmem:[%s3385_s25 + $0x324] sm:$0xf]  ;;  %v2171_v62 = vor.u32 %v2703_v52, %v2168_v54  ;;  %v2399_v23 = vor.u32 %v2762_v13, %v2398_v12  ;;  %v2790_v34 = vld [vmem:[%s3385_s25 + $0x3d4] sm:$0xf0] }
  0x93   : > { %1347 = vmatpush.bf16.msrb.mxu3 %v2475_v27  ;;  %v2424_v58 = vld [vmem:[%s3385_s25 + $0x330] sm:$0xf0]  ;;  %v2667_v60 = vld [vmem:[%s3385_s25 + $0x4] sm:$0xf]  ;;  %v2299_v63 = vor.u32 %v2735_v55, %v2296_v56  ;;  %v2527_v27 = vor.u32 %v2794_v19, %v2526_v18  ;;  %v2110_v38 = vld [vmem:[%s3385_s25 + $0xa8] sm:$0xf] }
  0x94   : > { %1309 = vmatpush.bf16.msrb.mxu0 %v2075_v35  ;;  %v2024_v61 = vld [vmem:[%s3385_s25 + $0x10] sm:$0xf0]  ;;  %v2699_v0 = vld [vmem:[%s3385_s25 + $0x104] sm:$0xf]  ;;  %v2427_v3 = vor.u32 %v2767_v57, %v2424_v58  ;;  %v2127_v35 = vor.u32 %v2694_v25, %v2126_v24  ;;  %v2690_v39 = vld [vmem:[%s3385_s25 + $0xb4] sm:$0xf0] }
  0x95   : > { %1322 = vmatpush.bf16.msrb.mxu1 %v2203_v36  ;;  %v2152_v1 = vld [vmem:[%s3385_s25 + $0x110] sm:$0xf0]  ;;  %v2731_v2 = vld [vmem:[%s3385_s25 + $0x204] sm:$0xf]  ;;  %v2027_v10 = vor.u32 %v2667_v60, %v2024_v61  ;;  %v2255_v36 = vor.u32 %v2726_v28, %v2254_v26  ;;  %v2238_v40 = vld [vmem:[%s3385_s25 + $0x1a8] sm:$0xf] }
  0x96   : > { %1335 = vmatpush.bf16.msrb.mxu2 %v2331_v37  ;;  %v2280_v4 = vld [vmem:[%s3385_s25 + $0x210] sm:$0xf0]  ;;  %v2763_v5 = vld [vmem:[%s3385_s25 + $0x304] sm:$0xf]  ;;  %v2155_v14 = vor.u32 %v2699_v0, %v2152_v1  ;;  %v2383_v37 = vor.u32 %v2758_v30, %v2382_v29  ;;  %v2722_v42 = vld [vmem:[%s3385_s25 + $0x1b4] sm:$0xf0] }
  0x97   : > { %1348 = vmatpush.bf16.msrb.mxu3 %v2459_v41  ;;  %v2408_v6 = vld [vmem:[%s3385_s25 + $0x310] sm:$0xf0]  ;;  %v2283_v15 = vor.u32 %v2731_v2, %v2280_v4  ;;  %v2511_v41 = vor.u32 %v2790_v34, %v2510_v33  ;;  %v2366_v43 = vld [vmem:[%s3385_s25 + $0x2a8] sm:$0xf]  ;;  %v2754_v44 = vld [vmem:[%s3385_s25 + $0x2b4] sm:$0xf0] }
  0x98   : > { %1310 = vmatpush.bf16.msrb.mxu0 %v2059_v47  ;;  %v2411_v20 = vor.u32 %v2763_v5, %v2408_v6  ;;  %v2494_v45 = vld [vmem:[%s3385_s25 + $0x3a8] sm:$0xf]  ;;  %v2786_v46 = vld [vmem:[%s3385_s25 + $0x3b4] sm:$0xf0]  ;;  %v2111_v47 = vor.u32 %v2690_v39, %v2110_v38 }
  0x99   : > { %1323 = vmatpush.bf16.msrb.mxu1 %v2187_v48  ;;  %v2239_v48 = vor.u32 %v2722_v42, %v2238_v40  ;;  %v2094_v50 = vld [vmem:[%s3385_s25 + $0x88] sm:$0xf]  ;;  %v2686_v51 = vld [vmem:[%s3385_s25 + $0x94] sm:$0xf0] }
  0x9a   : > { %1336 = vmatpush.bf16.msrb.mxu2 %v2315_v49  ;;  %v2367_v49 = vor.u32 %v2754_v44, %v2366_v43  ;;  %v2222_v52 = vld [vmem:[%s3385_s25 + $0x188] sm:$0xf]  ;;  %v2718_v54 = vld [vmem:[%s3385_s25 + $0x194] sm:$0xf0] }
  0x9b   : > { %1349 = vmatpush.bf16.msrb.mxu3 %v2443_v53  ;;  %v2495_v53 = vor.u32 %v2786_v46, %v2494_v45  ;;  %v2350_v55 = vld [vmem:[%s3385_s25 + $0x288] sm:$0xf]  ;;  %v2750_v56 = vld [vmem:[%s3385_s25 + $0x294] sm:$0xf0]  ;;  %v2223_v60 = vor.u32 %v2718_v54, %v2222_v52  ;;  %v2760_v52 = vld [vmem:[%s3385_s25 + $0x2ec] sm:$0xf] }
  0x9c   : > { %1311 = vmatpush.bf16.msrb.mxu0 %v2043_v59  ;;  %v2478_v57 = vld [vmem:[%s3385_s25 + $0x388] sm:$0xf]  ;;  %v2782_v58 = vld [vmem:[%s3385_s25 + $0x394] sm:$0xf0]  ;;  %v2095_v59 = vor.u32 %v2686_v51, %v2094_v50  ;;  %v2351_v61 = vor.u32 %v2750_v56, %v2350_v55  ;;  %v2272_v51 = vld [vmem:[%s3385_s25 + $0x1f8] sm:$0xf0] }
  0x9d   : > { %1324 = vmatpush.bf16.msrb.mxu1 %v2171_v62  ;;  %v2078_v62 = vld [vmem:[%s3385_s25 + $0x68] sm:$0xf]  ;;  %v2479_v1 = vor.u32 %v2782_v58, %v2478_v57  ;;  %v2714_v2 = vld [vmem:[%s3385_s25 + $0x174] sm:$0xf0]  ;;  %v2792_v56 = vld [vmem:[%s3385_s25 + $0x3ec] sm:$0xf] }
  0x9e   : > { %1337 = vmatpush.bf16.msrb.mxu2 %v2299_v63  ;;  %v2682_v63 = vld [vmem:[%s3385_s25 + $0x74] sm:$0xf0]  ;;  %v2206_v0 = vld [vmem:[%s3385_s25 + $0x168] sm:$0xf]  ;;  %v2528_v57 = vld [vmem:[%s3385_s25 + $0x3f8] sm:$0xf0] }
  0x9f   : > { %1350 = vmatpush.bf16.msrb.mxu3 %v2427_v3  ;;  %v2334_v3 = vld [vmem:[%s3385_s25 + $0x268] sm:$0xf]  ;;  %v2746_v4 = vld [vmem:[%s3385_s25 + $0x274] sm:$0xf0]  ;;  %v2079_v7 = vor.u32 %v2682_v63, %v2078_v62  ;;  %v2207_v8 = vor.u32 %v2714_v2, %v2206_v0  ;;  %v2692_v62 = vld [vmem:[%s3385_s25 + $0xcc] sm:$0xf] }
  0xa0   : > { %1312 = vmatpush.bf16.msrb.mxu0 %v2027_v10  ;;  %v2462_v5 = vld [vmem:[%s3385_s25 + $0x368] sm:$0xf]  ;;  %v2778_v6 = vld [vmem:[%s3385_s25 + $0x374] sm:$0xf0]  ;;  %v2335_v9 = vor.u32 %v2746_v4, %v2334_v3  ;;  %v2128_v63 = vld [vmem:[%s3385_s25 + $0xd8] sm:$0xf0] }
  0xa1   : > { %1325 = vmatpush.bf16.msrb.mxu1 %v2155_v14  ;;  %v2062_v10 = vld [vmem:[%s3385_s25 + $0x48] sm:$0xf]  ;;  %v2678_v11 = vld [vmem:[%s3385_s25 + $0x54] sm:$0xf0]  ;;  %v2463_v13 = vor.u32 %v2778_v6, %v2462_v5  ;;  %v2724_v0 = vld [vmem:[%s3385_s25 + $0x1cc] sm:$0xf] }
  0xa2   : > { %1338 = vmatpush.bf16.msrb.mxu2 %v2283_v15  ;;  %v2190_v12 = vld [vmem:[%s3385_s25 + $0x148] sm:$0xf]  ;;  %v2710_v14 = vld [vmem:[%s3385_s25 + $0x154] sm:$0xf0]  ;;  %v2256_v2 = vld [vmem:[%s3385_s25 + $0x1d8] sm:$0xf0] }
  0xa3   : > { %1351 = vmatpush.bf16.msrb.mxu3 %v2411_v20  ;;  %1313 = vmatmul.bf16.vlgmr.msrb.gmra.mxu0 %v3514_v31  ;;  %v2318_v15 = vld [vmem:[%s3385_s25 + $0x248] sm:$0xf]  ;;  %v2742_v18 = vld [vmem:[%s3385_s25 + $0x254] sm:$0xf0]  ;;  %v2756_v3 = vld [vmem:[%s3385_s25 + $0x2cc] sm:$0xf] }
  0xa4   : > { %1357 = vmatpush.bf16.msra.mxu0 %v2143_v21  ;;  %1326 = vmatmul.bf16.vlgmr.msrb.gmra.mxu1 %v3516_v32  ;;  %v2446_v19 = vld [vmem:[%s3385_s25 + $0x348] sm:$0xf]  ;;  %v2774_v20 = vld [vmem:[%s3385_s25 + $0x354] sm:$0xf0]  ;;  %v2063_v21 = vor.u32 %v2678_v11, %v2062_v10  ;;  %v2384_v4 = vld [vmem:[%s3385_s25 + $0x2d8] sm:$0xf0] }
  0xa5   : > { %1370 = vmatpush.bf16.msra.mxu1 %v2271_v22  ;;  %1339 = vmatmul.bf16.vlgmr.msrb.gmra.mxu2 %v3502_v16  ;;  %v2191_v22 = vor.u32 %v2710_v14, %v2190_v12  ;;  %v2046_v24 = vld [vmem:[%s3385_s25 + $0x28] sm:$0xf]  ;;  %v2674_v25 = vld [vmem:[%s3385_s25 + $0x34] sm:$0xf0]  ;;  %v2788_v5 = vld [vmem:[%s3385_s25 + $0x3cc] sm:$0xf] }
  0xa6   : > { %1383 = vmatpush.bf16.msra.mxu2 %v2399_v23  ;;  %1352 = vmatmul.bf16.vlgmr.msrb.gmra.mxu3 %v3504_v17  ;;  %v2319_v23 = vor.u32 %v2742_v18, %v2318_v15  ;;  %v2174_v26 = vld [vmem:[%s3385_s25 + $0x128] sm:$0xf]  ;;  %v2706_v28 = vld [vmem:[%s3385_s25 + $0x134] sm:$0xf0]  ;;  %v2512_v6 = vld [vmem:[%s3385_s25 + $0x3d8] sm:$0xf0] }
  0xa7   : > { %1396 = vmatpush.bf16.msra.mxu3 %v2527_v27  ;;  %v2447_v27 = vor.u32 %v2774_v20, %v2446_v19  ;;  %v2302_v29 = vld [vmem:[%s3385_s25 + $0x228] sm:$0xf]  ;;  %v2738_v30 = vld [vmem:[%s3385_s25 + $0x234] sm:$0xf0]  ;;  %v2175_v38 = vor.u32 %v2706_v28, %v2174_v26  ;;  %v2688_v10 = vld [vmem:[%s3385_s25 + $0xac] sm:$0xf] }
  0xa8   : > { %1358 = vmatpush.bf16.msra.mxu0 %v2127_v35  ;;  %v2430_v33 = vld [vmem:[%s3385_s25 + $0x328] sm:$0xf]  ;;  %v2770_v34 = vld [vmem:[%s3385_s25 + $0x334] sm:$0xf0]  ;;  %v2047_v35 = vor.u32 %v2674_v25, %v2046_v24  ;;  %v2303_v39 = vor.u32 %v2738_v30, %v2302_v29  ;;  %v2112_v11 = vld [vmem:[%s3385_s25 + $0xb8] sm:$0xf0] }
  0xa9   : > { %1371 = vmatpush.bf16.msra.mxu1 %v2255_v36  ;;  %v2030_v36 = vld [vmem:[%s3385_s25 + $0x8] sm:$0xf]  ;;  %v2431_v43 = vor.u32 %v2770_v34, %v2430_v33  ;;  %v2734_v44 = vld [vmem:[%s3385_s25 + $0x214] sm:$0xf0]  ;;  %v2720_v12 = vld [vmem:[%s3385_s25 + $0x1ac] sm:$0xf] }
  0xaa   : > { %1384 = vmatpush.bf16.msra.mxu2 %v2383_v37  ;;  %v2670_v37 = vld [vmem:[%s3385_s25 + $0x14] sm:$0xf0]  ;;  %v2158_v40 = vld [vmem:[%s3385_s25 + $0x108] sm:$0xf]  ;;  %v2240_v14 = vld [vmem:[%s3385_s25 + $0x1b8] sm:$0xf0] }
  0xab   : > { %1397 = vmatpush.bf16.msra.mxu3 %v2511_v41  ;;  %v2702_v41 = vld [vmem:[%s3385_s25 + $0x114] sm:$0xf0]  ;;  %v2286_v42 = vld [vmem:[%s3385_s25 + $0x208] sm:$0xf]  ;;  %v2031_v50 = vor.u32 %v2670_v37, %v2030_v36  ;;  %v2752_v15 = vld [vmem:[%s3385_s25 + $0x2ac] sm:$0xf] }
  0xac   : > { %1359 = vmatpush.bf16.msra.mxu0 %v2111_v47  ;;  %v2414_v45 = vld [vmem:[%s3385_s25 + $0x308] sm:$0xf]  ;;  %v2766_v46 = vld [vmem:[%s3385_s25 + $0x314] sm:$0xf0]  ;;  %v2696_v47 = vld [vmem:[%s3385_s25 + $0xec] sm:$0xf]  ;;  %v2159_v54 = vor.u32 %v2702_v41, %v2158_v40  ;;  %v2287_v55 = vor.u32 %v2734_v44, %v2286_v42 }
  0xad   : > { %1372 = vmatpush.bf16.msra.mxu1 %v2239_v48  ;;  %v2144_v48 = vld [vmem:[%s3385_s25 + $0xf8] sm:$0xf0]  ;;  %v2415_v58 = vor.u32 %v2766_v46, %v2414_v45  ;;  %v2784_v19 = vld [vmem:[%s3385_s25 + $0x3ac] sm:$0xf] }
  0xae   : > { %1385 = vmatpush.bf16.msra.mxu2 %v2367_v49  ;;  %v2728_v49 = vld [vmem:[%s3385_s25 + $0x1ec] sm:$0xf]  ;;  %v2368_v18 = vld [vmem:[%s3385_s25 + $0x2b8] sm:$0xf0] }
  0xaf   : > { %1398 = vmatpush.bf16.msra.mxu3 %v2495_v53  ;;  %v2400_v53 = vld [vmem:[%s3385_s25 + $0x2f8] sm:$0xf0]  ;;  %v2684_v24 = vld [vmem:[%s3385_s25 + $0x8c] sm:$0xf] }
  0xb0   : > { %1360 = vmatpush.bf16.msra.mxu0 %v2095_v59  ;;  %v2147_v59 = vor.u32 %v2696_v47, %v2144_v48  ;;  %v2496_v20 = vld [vmem:[%s3385_s25 + $0x3b8] sm:$0xf0]  ;;  %v2716_v26 = vld [vmem:[%s3385_s25 + $0x18c] sm:$0xf] }
  0xb1   : > { %1373 = vmatpush.bf16.msra.mxu1 %v2223_v60  ;;  %v2275_v60 = vor.u32 %v2728_v49, %v2272_v51  ;;  %v2096_v25 = vld [vmem:[%s3385_s25 + $0x98] sm:$0xf0]  ;;  %v2748_v29 = vld [vmem:[%s3385_s25 + $0x28c] sm:$0xf] }
  0xb2   : > { %1386 = vmatpush.bf16.msra.mxu2 %v2351_v61  ;;  %v2403_v61 = vor.u32 %v2760_v52, %v2400_v53  ;;  %v2224_v28 = vld [vmem:[%s3385_s25 + $0x198] sm:$0xf0]  ;;  %v2780_v33 = vld [vmem:[%s3385_s25 + $0x38c] sm:$0xf] }
  0xb3   : > { %1399 = vmatpush.bf16.msra.mxu3 %v2479_v1  ;;  %v2531_v1 = vor.u32 %v2792_v56, %v2528_v57  ;;  %v2352_v30 = vld [vmem:[%s3385_s25 + $0x298] sm:$0xf0]  ;;  %v2227_v36 = vor.u32 %v2716_v26, %v2224_v28  ;;  %v2712_v40 = vld [vmem:[%s3385_s25 + $0x16c] sm:$0xf] }
  0xb4   : > { %1361 = vmatpush.bf16.msra.mxu0 %v2079_v7  ;;  %v2131_v7 = vor.u32 %v2692_v62, %v2128_v63  ;;  %v2480_v34 = vld [vmem:[%s3385_s25 + $0x398] sm:$0xf0]  ;;  %v2355_v37 = vor.u32 %v2748_v29, %v2352_v30  ;;  %v2776_v45 = vld [vmem:[%s3385_s25 + $0x36c] sm:$0xf] }
  0xb5   : > { %1374 = vmatpush.bf16.msra.mxu1 %v2207_v8  ;;  %v2259_v8 = vor.u32 %v2724_v0, %v2256_v2  ;;  %v2483_v41 = vor.u32 %v2780_v33, %v2480_v34  ;;  %v2208_v42 = vld [vmem:[%s3385_s25 + $0x178] sm:$0xf0]  ;;  %v2708_v52 = vld [vmem:[%s3385_s25 + $0x14c] sm:$0xf]  ;;  %v465_v33 = vld [vmem:[#allocation2 + $0x10] sm:$0xff] }
  0xb6   : > { %1387 = vmatpush.bf16.msra.mxu2 %v2335_v9  ;;  %v2387_v9 = vor.u32 %v2756_v3, %v2384_v4  ;;  %v2336_v44 = vld [vmem:[%s3385_s25 + $0x278] sm:$0xf0]  ;;  %v2211_v48 = vor.u32 %v2712_v40, %v2208_v42  ;;  %v2772_v57 = vld [vmem:[%s3385_s25 + $0x34c] sm:$0xf]  ;;  %v466_v42 = vld [vmem:[#allocation2] sm:$0xff] }
  0xb7   : > { %1400 = vmatpush.bf16.msra.mxu3 %v2463_v13  ;;  %v2515_v13 = vor.u32 %v2788_v5, %v2512_v6  ;;  %v2464_v46 = vld [vmem:[%s3385_s25 + $0x378] sm:$0xf0]  ;;  %v2672_v62 = vld [vmem:[%s3385_s25 + $0x2c] sm:$0xf] }
  0xb8   : > { %1362 = vmatpush.bf16.msra.mxu0 %v2063_v21  ;;  %v2115_v21 = vor.u32 %v2688_v10, %v2112_v11  ;;  %v2064_v51 = vld [vmem:[%s3385_s25 + $0x58] sm:$0xf0]  ;;  %v2467_v53 = vor.u32 %v2776_v45, %v2464_v46  ;;  %v2704_v0 = vld [vmem:[%s3385_s25 + $0x12c] sm:$0xf] }
  0xb9   : > { %1375 = vmatpush.bf16.msra.mxu1 %v2191_v22  ;;  %v2243_v22 = vor.u32 %v2720_v12, %v2240_v14  ;;  %v2320_v56 = vld [vmem:[%s3385_s25 + $0x258] sm:$0xf0]  ;;  %v2736_v3 = vld [vmem:[%s3385_s25 + $0x22c] sm:$0xf] }
  0xba   : > { %1388 = vmatpush.bf16.msra.mxu2 %v2319_v23  ;;  %v2371_v23 = vor.u32 %v2752_v15, %v2368_v18  ;;  %v2048_v63 = vld [vmem:[%s3385_s25 + $0x38] sm:$0xf0]  ;;  %v2768_v5 = vld [vmem:[%s3385_s25 + $0x32c] sm:$0xf] }
  0xbb   : > { %1401 = vmatpush.bf16.msra.mxu3 %v2447_v27  ;;  %v2499_v27 = vor.u32 %v2784_v19, %v2496_v20  ;;  %v2176_v2 = vld [vmem:[%s3385_s25 + $0x138] sm:$0xf0]  ;;  %v2668_v10 = vld [vmem:[%s3385_s25 + $0xc] sm:$0xf] }
  0xbc   : > { %1363 = vmatpush.bf16.msra.mxu0 %v2047_v35  ;;  %v2099_v35 = vor.u32 %v2684_v24, %v2096_v25  ;;  %v2304_v4 = vld [vmem:[%s3385_s25 + $0x238] sm:$0xf0]  ;;  %v2700_v12 = vld [vmem:[%s3385_s25 + $0x10c] sm:$0xf] }
  0xbd   : > { %1376 = vmatpush.bf16.msra.mxu1 %v2175_v38  ;;  %v2680_v38 = vld [vmem:[%s3385_s25 + $0x6c] sm:$0xf]  ;;  %v2432_v6 = vld [vmem:[%s3385_s25 + $0x338] sm:$0xf0] }
  0xbe   : > { %1389 = vmatpush.bf16.msra.mxu2 %v2303_v39  ;;  %v2080_v39 = vld [vmem:[%s3385_s25 + $0x78] sm:$0xf0]  ;;  %v2732_v15 = vld [vmem:[%s3385_s25 + $0x20c] sm:$0xf] }
  0xbf   : > { %1402 = vmatpush.bf16.msra.mxu3 %v2431_v43  ;;  %v2744_v43 = vld [vmem:[%s3385_s25 + $0x26c] sm:$0xf]  ;;  %v2083_v47 = vor.u32 %v2680_v38, %v2080_v39  ;;  %v2032_v11 = vld [vmem:[%s3385_s25 + $0x18] sm:$0xf0] }
  0xc0   : > { %1364 = vmatpush.bf16.msra.mxu0 %v2031_v50  ;;  %v2339_v49 = vor.u32 %v2744_v43, %v2336_v44  ;;  %v2676_v50 = vld [vmem:[%s3385_s25 + $0x4c] sm:$0xf]  ;;  %v2160_v14 = vld [vmem:[%s3385_s25 + $0x118] sm:$0xf0] }
  0xc1   : > { %1377 = vmatpush.bf16.msra.mxu1 %v2159_v54  ;;  %v2192_v54 = vld [vmem:[%s3385_s25 + $0x158] sm:$0xf0]  ;;  %v2764_v19 = vld [vmem:[%s3385_s25 + $0x30c] sm:$0xf] }
  0xc2   : > { %1390 = vmatpush.bf16.msra.mxu2 %v2287_v55  ;;  %v2740_v55 = vld [vmem:[%s3385_s25 + $0x24c] sm:$0xf]  ;;  %v2288_v18 = vld [vmem:[%s3385_s25 + $0x218] sm:$0xf0] }
  0xc3   : > { %1403 = vmatpush.bf16.msra.mxu3 %v2415_v58  ;;  %1365 = vmatmul.bf16.vlgmr.msra.gmra.mxu0 %v3514_v31  ;;  %v2448_v58 = vld [vmem:[%s3385_s25 + $0x358] sm:$0xf0] }
  0xc4   : > { %1409 = vmatpush.bf16.msrb.mxu0 %v2147_v59  ;;  %1378 = vmatmul.bf16.vlgmr.msra.gmra.mxu1 %v3516_v32  ;;  %v2067_v59 = vor.u32 %v2676_v50, %v2064_v51  ;;  %v2416_v20 = vld [vmem:[%s3385_s25 + $0x318] sm:$0xf0] }
  0xc5   : > { %1422 = vmatpush.bf16.msrb.mxu1 %v2275_v60  ;;  %1391 = vmatmul.bf16.vlgmr.msra.gmra.mxu2 %v3502_v16  ;;  %v2195_v60 = vor.u32 %v2708_v52, %v2192_v54  ;;  %v2419_v24 = vor.u32 %v2764_v19, %v2416_v20 }
  0xc6   : > { %1435 = vmatpush.bf16.msrb.mxu2 %v2403_v61  ;;  %1404 = vmatmul.bf16.vlgmr.msra.gmra.mxu3 %v3504_v17  ;;  %v2323_v61 = vor.u32 %v2740_v55, %v2320_v56  ;;  %v467_v55 = vld [vmem:[#allocation2 + $0x18] sm:$0xff] }
  0xc7   : > { %1448 = vmatpush.bf16.msrb.mxu3 %v2531_v1  ;;  %v2451_v1 = vor.u32 %v2772_v57, %v2448_v58 }
  0xc8   : > { %1410 = vmatpush.bf16.msrb.mxu0 %v2131_v7  ;;  %v2051_v7 = vor.u32 %v2672_v62, %v2048_v63 }
  0xc9   : > { %1423 = vmatpush.bf16.msrb.mxu1 %v2259_v8  ;;  %v2179_v8 = vor.u32 %v2704_v0, %v2176_v2 }
  0xca   : > { %1436 = vmatpush.bf16.msrb.mxu2 %v2387_v9  ;;  %v2307_v9 = vor.u32 %v2736_v3, %v2304_v4 }
  0xcb   : > { %1449 = vmatpush.bf16.msrb.mxu3 %v2515_v13  ;;  %v2435_v13 = vor.u32 %v2768_v5, %v2432_v6  ;;  %v468_v5 = vld [vmem:[#allocation2 + $0x8] sm:$0xff] }
  0xcc   : > { %1411 = vmatpush.bf16.msrb.mxu0 %v2115_v21  ;;  %v2035_v21 = vor.u32 %v2668_v10, %v2032_v11 }
  0xcd   : > { %1424 = vmatpush.bf16.msrb.mxu1 %v2243_v22  ;;  %v2163_v22 = vor.u32 %v2700_v12, %v2160_v14 }
  0xce   : > { %1437 = vmatpush.bf16.msrb.mxu2 %v2371_v23  ;;  %v2291_v23 = vor.u32 %v2732_v15, %v2288_v18 }
  0xcf   : > { %1450 = vmatpush.bf16.msrb.mxu3 %v2499_v27 }
  0xd0   : > { %1412 = vmatpush.bf16.msrb.mxu0 %v2099_v35 }
  0xd1   : > { %1425 = vmatpush.bf16.msrb.mxu1 %v2227_v36 }
  0xd2   : > { %1438 = vmatpush.bf16.msrb.mxu2 %v2355_v37 }
  0xd3   : > { %1451 = vmatpush.bf16.msrb.mxu3 %v2483_v41 }
  0xd4   : > { %1413 = vmatpush.bf16.msrb.mxu0 %v2083_v47 }
  0xd5   : > { %1426 = vmatpush.bf16.msrb.mxu1 %v2211_v48 }
  0xd6   : > { %1439 = vmatpush.bf16.msrb.mxu2 %v2339_v49 }
  0xd7   : > { %1452 = vmatpush.bf16.msrb.mxu3 %v2467_v53 }
  0xd8   : > { %1414 = vmatpush.bf16.msrb.mxu0 %v2067_v59 }
  0xd9   : > { %1427 = vmatpush.bf16.msrb.mxu1 %v2195_v60 }
  0xda   : > { %1440 = vmatpush.bf16.msrb.mxu2 %v2323_v61 }
  0xdb   : > { %1453 = vmatpush.bf16.msrb.mxu3 %v2451_v1 }
  0xdc   : > { %1415 = vmatpush.bf16.msrb.mxu0 %v2051_v7 }
  0xdd   : > { %1428 = vmatpush.bf16.msrb.mxu1 %v2179_v8 }
  0xde   : > { %1441 = vmatpush.bf16.msrb.mxu2 %v2307_v9 }
  0xdf   : > { %1454 = vmatpush.bf16.msrb.mxu3 %v2435_v13 }
  0xe0   : > { %1416 = vmatpush.bf16.msrb.mxu0 %v2035_v21 }
  0xe1   : > { %1429 = vmatpush.bf16.msrb.mxu1 %v2163_v22 }
  0xe2   : > { %1442 = vmatpush.bf16.msrb.mxu2 %v2291_v23 }
  0xe3   : > { %1455 = vmatpush.bf16.msrb.mxu3 %v2419_v24  ;;  %1417 = vmatmul.bf16.vlgmr.msrb.gmra.mxu0 %v3514_v31 }
  0xe4   : > { %1430 = vmatmul.bf16.vlgmr.msrb.gmra.mxu1 %v3516_v32 }
  0xe5   : > { %1443 = vmatmul.bf16.vlgmr.msrb.gmra.mxu2 %v3502_v16 }
  0xe6   : > { %1456 = vmatmul.bf16.vlgmr.msrb.gmra.mxu3 %v3504_v17 }
 0x109   : > { %v1275_v25 = vpop.f32.mrf.mxu1  ;;  %v1301_v30 = vpop.f32.mrf.mxu3 }
 0x10a   : > { %v1262_v26 = vpop.f32.mrf.mxu0  ;;  %v1288_v28 = vpop.f32.mrf.mxu2 }
 0x10b   : > { %v1276_v27 = vadd.f32 %v1275_v25, %v1262_v26 }
 0x10d   : > { %v1289_v29 = vadd.f32 %v1288_v28, %v1276_v27 }
 0x10f   : > { %v1302_v34 = vadd.f32 %v1301_v30, %v1289_v29 }
 0x111   : > { %v1277_v35 = vpop.f32.mrf.mxu1  ;;  %v1461_v36 = vadd.f32 %v1302_v34, %v465_v33  ;;  %v1303_v31 = vpop.f32.mrf.mxu3 }
 0x112   : > { %v1264_v37 = vpop.f32.mrf.mxu0  ;;  %v1290_v38 = vpop.f32.mrf.mxu2 }
 0x113   : > { %1465 = vst [vmem:[#allocation2 + $0x10] sm:$0xff] %v1461_v36 }
 0x120   : > { %v1314_v39 = vpop.f32.mrf.mxu0 }
 0x121   : > { %v1327_v32 = vpop.f32.mrf.mxu1 }
 0x122   : > { %v1328_v40 = vadd.f32 %v1327_v32, %v1314_v39 }
 0x128   : > { %v1340_v16 = vpop.f32.mrf.mxu2  ;;  %v1316_v44 = vpop.f32.mrf.mxu0 }
 0x129   : > { %v1341_v41 = vadd.f32 %v1340_v16, %v1328_v40  ;;  %v1353_v17 = vpop.f32.mrf.mxu3  ;;  %v1329_v45 = vpop.f32.mrf.mxu1 }
 0x12b   : > { %v1354_v43 = vadd.f32 %v1353_v17, %v1341_v41 }
 0x12d   : > { %v1462_v46 = vadd.f32 %v1354_v43, %v466_v42 }
 0x12f   : > { %1466 = vst [vmem:[#allocation2] sm:$0xff] %v1462_v46 }
 0x130   : > { %v1342_v47 = vpop.f32.mrf.mxu2 }
 0x131   : > { %v1355_v48 = vpop.f32.mrf.mxu3 }
 0x140   : > { %v1366_v49 = vpop.f32.mrf.mxu0 }
 0x141   : > { %v1379_v50 = vpop.f32.mrf.mxu1 }
 0x142   : > { %v1380_v51 = vadd.f32 %v1379_v50, %v1366_v49 }
 0x148   : > { %v1392_v52 = vpop.f32.mrf.mxu2  ;;  %v1368_v57 = vpop.f32.mrf.mxu0 }
 0x149   : > { %v1393_v53 = vadd.f32 %v1392_v52, %v1380_v51  ;;  %v1405_v54 = vpop.f32.mrf.mxu3  ;;  %v1381_v58 = vpop.f32.mrf.mxu1 }
 0x14b   : > { %v1406_v56 = vadd.f32 %v1405_v54, %v1393_v53 }
 0x14d   : > { %v1463_v59 = vadd.f32 %v1406_v56, %v467_v55 }
 0x14f   : > { %1467 = vst [vmem:[#allocation2 + $0x18] sm:$0xff] %v1463_v59 }
 0x150   : > { %v1394_v60 = vpop.f32.mrf.mxu2 }
 0x151   : > { %v1407_v61 = vpop.f32.mrf.mxu3 }
 0x160   : > { %v1418_v62 = vpop.f32.mrf.mxu0 }
 0x161   : > { %v1431_v63 = vpop.f32.mrf.mxu1 }
 0x162   : > { %v1432_v0 = vadd.f32 %v1431_v63, %v1418_v62 }
 0x168   : > { %v1444_v1 = vpop.f32.mrf.mxu2  ;;  %v1420_v4 = vpop.f32.mrf.mxu0 }
 0x169   : > { %v1445_v2 = vadd.f32 %v1444_v1, %v1432_v0  ;;  %v1457_v3 = vpop.f32.mrf.mxu3  ;;  %v1433_v6 = vpop.f32.mrf.mxu1 }
 0x16b   : > { %v1458_v7 = vadd.f32 %v1457_v3, %v1445_v2 }
 0x16d   : > { %v1464_v8 = vadd.f32 %v1458_v7, %v468_v5  ;;  %1472 = sbr.rel (%p2532_p1) target bundleno = 801 (0x321), region = 92 }
 0x16f   : > { %1468 = vst [vmem:[#allocation2 + $0x8] sm:$0xff] %v1464_v8 }
 0x170   : > { %v1446_v9 = vpop.f32.mrf.mxu2 }
 0x171   : > { %v1459_v10 = vpop.f32.mrf.mxu3 }
 0x172   : > { %v2802_v11 = vld [vmem:[#allocation8 + $0x38] sm:$0xff]  ;;  %v2801_v15 = vld [vmem:[#allocation8 + $0x30] sm:$0xff]  ;;  %v2800_v21 = vld [vmem:[#allocation8 + $0x28] sm:$0xff]  ;;  %vm1861_vm0 = vcmask 261120   ;;  %vm1885_vm1 = vcmask 15360  }
 0x173   : > { %v2810_v12 = vld [vmem:[#allocation8 + $0x78] sm:$0xff]  ;;  %1759 = vmatpush.bf16.msra.mxu0 %v2802_v11  ;;  %v2809_v18 = vld [vmem:[#allocation8 + $0x70] sm:$0xff]  ;;  %v2808_v22 = vld [vmem:[#allocation8 + $0x68] sm:$0xff] }
 0x174   : > { %v2818_v13 = vld [vmem:[#allocation8 + $0xb8] sm:$0xff]  ;;  %1772 = vmatpush.bf16.msra.mxu1 %v2810_v12  ;;  %v2817_v19 = vld [vmem:[#allocation8 + $0xb0] sm:$0xff]  ;;  %v2816_v23 = vld [vmem:[#allocation8 + $0xa8] sm:$0xff] }
 0x175   : > { %v2826_v14 = vld [vmem:[#allocation8 + $0xf8] sm:$0xff]  ;;  %1785 = vmatpush.bf16.msra.mxu2 %v2818_v13  ;;  %v2825_v20 = vld [vmem:[#allocation8 + $0xf0] sm:$0xff]  ;;  %v2824_v24 = vld [vmem:[#allocation8 + $0xe8] sm:$0xff] }
 0x176   : > { %1798 = vmatpush.bf16.msra.mxu3 %v2826_v14  ;;  %v2799_v25 = vld [vmem:[#allocation8 + $0x20] sm:$0xff]  ;;  %v2798_v29 = vld [vmem:[#allocation8 + $0x18] sm:$0xff]  ;;  %v2797_v36 = vld [vmem:[#allocation8 + $0x10] sm:$0xff] }
 0x177   : > { %1760 = vmatpush.bf16.msra.mxu0 %v2801_v15  ;;  %v2807_v26 = vld [vmem:[#allocation8 + $0x60] sm:$0xff]  ;;  %v2806_v30 = vld [vmem:[#allocation8 + $0x58] sm:$0xff]  ;;  %v2805_v37 = vld [vmem:[#allocation8 + $0x50] sm:$0xff] }
 0x178   : > { %1773 = vmatpush.bf16.msra.mxu1 %v2809_v18  ;;  %v2815_v27 = vld [vmem:[#allocation8 + $0xa0] sm:$0xff]  ;;  %v1477_v33 = vld [vmem:[#allocation7] sm:$0xf]  ;;  %v2813_v39 = vld [vmem:[#allocation8 + $0x90] sm:$0xff] }
 0x179   : > { %1786 = vmatpush.bf16.msra.mxu2 %v2817_v19  ;;  %v2823_v28 = vld [vmem:[#allocation8 + $0xe0] sm:$0xff]  ;;  %v2814_v34 = vld [vmem:[#allocation8 + $0x98] sm:$0xff]  ;;  %v1479_v38 = vperm.slane %v1477_v33, 0  ;;  %v1480_v31 = vperm.slane %v1477_v33, 1  ;;  %v1473_v32 = vld [vmem:[#allocation2 + $0x10] sm:$0xff]  ;;  %v1481_v16 = vperm.slane %v1477_v33, 2 }
 0x17a   : > { %1799 = vmatpush.bf16.msra.mxu3 %v2825_v20  ;;  %v2822_v35 = vld [vmem:[#allocation8 + $0xd8] sm:$0xff]  ;;  %v1482_v41 = vperm.slane %v1477_v33, 3  ;;  %v2821_v17 = vld [vmem:[#allocation8 + $0xd0] sm:$0xff]  ;;  %v1476_v43 = vld [vmem:[#allocation2 + $0x8] sm:$0xff] }
 0x17b   : > { %1761 = vmatpush.bf16.msra.mxu0 %v2800_v21  ;;  %v1474_v40 = vld [vmem:[#allocation2] sm:$0xff]  ;;  %v1475_v42 = vld [vmem:[#allocation2 + $0x18] sm:$0xff]  ;;  %v1487_v44 = vadd.f32 %v1479_v38, %v1473_v32  ;;  %v2796_v46 = vld [vmem:[#allocation8 + $0x8] sm:$0xff] }
 0x17c   : > { %1774 = vmatpush.bf16.msra.mxu1 %v2808_v22  ;;  %v1488_v45 = vadd.f32 %v1480_v31, %v1474_v40  ;;  %v2804_v47 = vld [vmem:[#allocation8 + $0x48] sm:$0xff]  ;;  %v1489_v48 = vadd.f32 %v1481_v16, %v1475_v42  ;;  %v1490_v49 = vadd.f32 %v1482_v41, %v1476_v43  ;;  %v2795_v54 = vld [vmem:[#allocation8] sm:$0xff]  ;;  %v1827_v62 = vld [vmem:[%s3769_s5 + $0x78] sm:$0xff] }
 0x17d   : > { %1787 = vmatpush.bf16.msra.mxu2 %v2816_v23  ;;  %v2812_v50 = vld [vmem:[#allocation8 + $0x88] sm:$0xff]  ;;  %v1491_v52 = vmax.f32 %v1487_v44, 0.0  ;;  %v2803_v55 = vld [vmem:[#allocation8 + $0x40] sm:$0xff]  ;;  %v1823_v4 = vld [vmem:[%s3769_s5 + $0x58] sm:$0xff] }
 0x17e   : > { %1800 = vmatpush.bf16.msra.mxu3 %v2824_v24  ;;  %v2820_v51 = vld [vmem:[#allocation8 + $0xc8] sm:$0xff]  ;;  %v1492_v53 = vmax.f32 %v1488_v45, 0.0  ;;  %v1493_v56 = vmax.f32 %v1489_v48, 0.0  ;;  %v1494_v57 = vmax.f32 %v1490_v49, 0.0  ;;  %v2811_v58 = vld [vmem:[#allocation8 + $0x80] sm:$0xff]  ;;  %v1819_v8 = vld [vmem:[%s3769_s5 + $0x38] sm:$0xff] }
 0x17f   : > { %1762 = vmatpush.bf16.msra.mxu0 %v2799_v25  ;;  %v2819_v59 = vld [vmem:[#allocation8 + $0xc0] sm:$0xff]  ;;  %v1495_v60 = vpack.c.bf16 %v1491_v52, %v1491_v52  ;;  %v1826_v1 = vld [vmem:[%s3769_s5 + $0x70] sm:$0xff]  ;;  %v1815_v12 = vld [vmem:[%s3769_s5 + $0x18] sm:$0xff] }
 0x180   : > { %1775 = vmatpush.bf16.msra.mxu1 %v2807_v26  ;;  %v1496_v61 = vpack.c.bf16 %v1492_v53, %v1492_v53  ;;  %v1497_v63 = vpack.c.bf16 %v1493_v56, %v1493_v56  ;;  %v1498_v0 = vpack.c.bf16 %v1494_v57, %v1494_v57  ;;  %v1825_v2 = vld [vmem:[%s3769_s5 + $0x68] sm:$0xff]  ;;  %v1824_v3 = vld [vmem:[%s3769_s5 + $0x60] sm:$0xff]  ;;  %v1822_v5 = vld [vmem:[%s3769_s5 + $0x50] sm:$0xff] }
 0x181   : > { %1788 = vmatpush.bf16.msra.mxu2 %v2815_v27  ;;  %v1821_v6 = vld [vmem:[%s3769_s5 + $0x48] sm:$0xff]  ;;  %v1820_v7 = vld [vmem:[%s3769_s5 + $0x40] sm:$0xff]  ;;  %v1818_v9 = vld [vmem:[%s3769_s5 + $0x30] sm:$0xff] }
 0x182   : > { %1801 = vmatpush.bf16.msra.mxu3 %v2823_v28  ;;  %v1817_v10 = vld [vmem:[%s3769_s5 + $0x28] sm:$0xff]  ;;  %v1816_v11 = vld [vmem:[%s3769_s5 + $0x20] sm:$0xff]  ;;  %v1814_v13 = vld [vmem:[%s3769_s5 + $0x10] sm:$0xff] }
 0x183   : > { %1763 = vmatpush.bf16.msra.mxu0 %v2798_v29  ;;  %v1813_v14 = vld [vmem:[%s3769_s5 + $0x8] sm:$0xff]  ;;  %v1812_v15 = vld [vmem:[%s3769_s5] sm:$0xff]  ;;  %v1856_v18 = vld [vmem:[%s3771_s7 + $0x18] sm:$0xff] }
 0x184   : > { %1776 = vmatpush.bf16.msra.mxu1 %v2806_v30  ;;  %v1855_v19 = vld [vmem:[%s3771_s7 + $0x10] sm:$0xff]  ;;  %v1854_v20 = vld [vmem:[%s3771_s7 + $0x8] sm:$0xff]  ;;  %v2927_v21 = vld [vmem:[#allocation10] ss:$0 sm:$0xff] }
 0x185   : > { %1789 = vmatpush.bf16.msra.mxu2 %v2814_v34  ;;  %v2928_v38 = vld [vmem:[#allocation11] ss:$0 sm:$0xff]  ;;  %v2929_v40 = vld [vmem:[#allocation13] ss:$0 sm:$0xff] }
 0x186   : > { %1802 = vmatpush.bf16.msra.mxu3 %v2822_v35 }
 0x187   : > { %1764 = vmatpush.bf16.msra.mxu0 %v2797_v36 }
 0x188   : > { %1777 = vmatpush.bf16.msra.mxu1 %v2805_v37  ;;  %v1853_v37 = vld [vmem:[%s3771_s7] sm:$0xff] }
 0x189   : > { %1790 = vmatpush.bf16.msra.mxu2 %v2813_v39 }
 0x18a   : > { %1803 = vmatpush.bf16.msra.mxu3 %v2821_v17 }
 0x18b   : > { %1765 = vmatpush.bf16.msra.mxu0 %v2796_v46 }
 0x18c   : > { %1778 = vmatpush.bf16.msra.mxu1 %v2804_v47 }
 0x18d   : > { %1791 = vmatpush.bf16.msra.mxu2 %v2812_v50 }
 0x18e   : > { %1804 = vmatpush.bf16.msra.mxu3 %v2820_v51 }
 0x18f   : > { %1766 = vmatpush.bf16.msra.mxu0 %v2795_v54 }
 0x190   : > { %1779 = vmatpush.bf16.msra.mxu1 %v2803_v55 }
 0x191   : > { %1792 = vmatpush.bf16.msra.mxu2 %v2811_v58 }
 0x192   : > { %1805 = vmatpush.bf16.msra.mxu3 %v2819_v59  ;;  %1767 = vmatmul.bf16.vlgmr.msra.gmra.mxu0 %v1495_v60 }
 0x193   : > { %1832 = vmatpush.msrb.mxu0 %v1827_v62  ;;  %1780 = vmatmul.bf16.vlgmr.msra.gmra.mxu1 %v1496_v61 }
 0x194   : > { %1793 = vmatmul.bf16.vlgmr.msra.gmra.mxu2 %v1497_v63  ;;  %1877 = vmatpush.msrb.mxu1 %v1856_v18 }
 0x195   : > { %1806 = vmatmul.bf16.vlgmr.msra.gmra.mxu3 %v1498_v0  ;;  %1833 = vmatpush.msrb.mxu0 %v1826_v1 }
 0x196   : > { %1878 = vmatpush.msrb.mxu1 %v1855_v19 }
 0x197   : > { %1834 = vmatpush.msrb.mxu0 %v1825_v2 }
 0x198   : > { %1879 = vmatpush.msrb.mxu1 %v1854_v20 }
 0x199   : > { %1835 = vmatpush.msrb.mxu0 %v1824_v3 }
 0x19a   : > { %1880 = vmatpush.msrb.mxu1 %v1853_v37 }
 0x19b   : > { %1836 = vmatpush.msrb.mxu0 %v1823_v4 }
 0x19d   : > { %1837 = vmatpush.msrb.mxu0 %v1822_v5 }
 0x19f   : > { %1838 = vmatpush.msrb.mxu0 %v1821_v6 }
 0x1a1   : > { %1839 = vmatpush.msrb.mxu0 %v1820_v7 }
 0x1a3   : > { %1840 = vmatpush.msrb.mxu0 %v1819_v8 }
 0x1a5   : > { %1841 = vmatpush.msrb.mxu0 %v1818_v9 }
 0x1a7   : > { %1842 = vmatpush.msrb.mxu0 %v1817_v10 }
 0x1a9   : > { %1843 = vmatpush.msrb.mxu0 %v1816_v11 }
 0x1ab   : > { %1844 = vmatpush.msrb.mxu0 %v1815_v12 }
 0x1ad   : > { %1845 = vmatpush.msrb.mxu0 %v1814_v13 }
 0x1af   : > { %1846 = vmatpush.msrb.mxu0 %v1813_v14 }
 0x1b1   : > { %1847 = vmatpush.msrb.mxu0 %v1812_v15 }
 0x20f   : > { %v1768_v22 = vpop.f32.mrf.mxu0 }
 0x210   : > { %v1781_v23 = vpop.f32.mrf.mxu1  ;;  %v1769_v24 = vadd.f32 %v2927_v21, %v1768_v22 }
 0x212   : > { %v1782_v25 = vadd.f32 %v1781_v23, %v1769_v24 }
 0x217   : > { %v1794_v26 = vpop.f32.mrf.mxu2  ;;  %v1770_v29 = vpop.f32.mrf.mxu0 }
 0x218   : > { %v1807_v27 = vpop.f32.mrf.mxu3  ;;  %v1795_v28 = vadd.f32 %v1794_v26, %v1782_v25  ;;  %v1783_v30 = vpop.f32.mrf.mxu1 }
 0x21a   : > { %v1808_v33 = vadd.f32 %v1807_v27, %v1795_v28 }
 0x21c   : > { %v1811_v34 = vmax.f32 %v1808_v33, 0.0 }
 0x21e   : > { %1848 = vmatmul.f32.vlgmr.msrb.gmra.mxu0 %v1811_v34 }
 0x21f   : > { %v1796_v35 = vpop.f32.mrf.mxu2 }
 0x220   : > { %v1809_v36 = vpop.f32.mrf.mxu3 }
 0x29b   : > { %v1849_v31 = vpop.f32.mrf.mxu0 }
 0x29c   : > { %v1850_v39 = vadd.f32 %v2928_v38, %v1849_v31 }
 0x29e   : > { %v1852_v32 = vmax.f32 %v1850_v39, 0.0 }
 0x2a0   : > { %2661 = vmatmul.msk.f32.vlgmr.msrb.gmra.mxu1 %vm1861_vm0, %v1852_v32 }
 0x31d   : > { %v1882_v16 = vpop.f32.mrf.mxu1 }
 0x31e   : > { %v1883_v41 = vadd.f32 %v2929_v40, %v1882_v16 }
 0x320   : > { %1886 = vst.msk [vmem:[%s3773_s9] sm:$0xff] %vm1885_vm1, %v1883_v41 }
 0x321 PF: > { %p24_p3 = scmp.ge.s32.totalorder %s3317_s29, 7   ;;  %s3788_s30 = smov %s3182_s10 }
 0x322   : > { %s3789_s10 = smov %s3186_s11  ;;  %s3790_s11 = smov %s3328_s18 }
 0x323   : > { %s3791_s12 = smov %s3317_s29  ;;  %26 = sbr.rel (!%p24_p3) target bundleno = 13 (0xd), region = 133 }
 0x328   :  { %1898 = vsyncpa [#allocation4], 1 }
 0x329   :  { %1900 = vsyncpa [#allocation4 + $0x1], 1 }
 0x32a   :  { %1901 = vsyncpa [#allocation6], 1 }
 0x32b   :  { %1903 = vsyncpa [#allocation6 + $0x1], 1 }
 0x32c   :  { %1904 = vsyncpa [#allocation9], 1 }
 0x32d   :  { %1905 = vsyncpa [#allocation12], 1 }

</bundles_post_ra>
